<compile_context>
chip_gen: v6e
topology: v6e:2x2x1
jax: 0.10.0
libtpu: 0.0.40
codegen_flags: <defaults>
</compile_context>

<pallas_src>
import functools
import math

import jax
import jax.numpy as jnp
from jax.experimental import pallas as pl
from jax.experimental.pallas import tpu as pltpu


def _largest_divisor_leq(n, k):
    k = max(1, min(n, k))
    for d in range(k, 0, -1):
        if n % d == 0:
            return d
    return 1


def _vmem_capacity_bytes():
    try:
        return int(pltpu.get_tpu_info().vmem_capacity_bytes)
    except Exception:
        return 64 * 1024 * 1024  # conservative (v7x per-TC)


def _conv_stats_kernel(x_ref, w_ref, y_ref, st_ref, *, tr, out_w, dil, inv_cnt):
    # x_ref : (1, Hp, Wp, Cin) bf16  whole padded image; resident across the
    #         row-tile grid axis (index_map ignores t => DMA'd once per image)
    # w_ref : (9*Cin, Cp)      bf16  taps folded into the contraction (K) dim
    # y_ref : (tr, out_w, Cout) bf16 conv tile, truncated to Cout
    # st_ref: (1, 2, Cp)       f32   [per-tile mean ; per-tile M2]
    t = pl.program_id(1)
    row0 = pl.multiple_of(t * tr, tr)
    cin = x_ref.shape[-1]
    cp = w_ref.shape[-1]
    cout = y_ref.shape[-1]

    # im2col patch from ref-side (dynamic-start) loads; single K=9*Cin matmul
    # keeps accumulation inside the MXU (no per-tap acc read-modify-write).
    taps = [x_ref[0,
                  pl.ds(row0 + kh * dil, tr),
                  pl.ds(kw * dil, out_w), :]
            for kh in range(3) for kw in range(3)]
    patch = jnp.concatenate(taps, axis=-1).reshape(tr * out_w, 9 * cin)

    acc = jnp.dot(patch, w_ref[...],
                  preferred_element_type=jnp.float32)   # (tr*out_w, cp) f32

    y_ref[...] = acc[:, :cout].reshape(tr, out_w, cout).astype(y_ref.dtype)

    m = jnp.sum(acc, axis=0, keepdims=True) * inv_cnt   # per-tile mean (1, cp)
    d = acc - m
    m2 = jnp.sum(d * d, axis=0, keepdims=True)          # per-tile M2   (1, cp)
    st_ref[...] = jnp.concatenate([m, m2], axis=0).reshape(1, 2, cp)


def _bn_relu_kernel(y_ref, scale_ref, shift_ref, o_ref):
    # y_ref: (tr2, W, Cout) bf16 ; scale/shift: (1, 1, Cout) f32 (fused affine)
    y = y_ref[...].astype(jnp.float32)
    o_ref[...] = jnp.maximum(y * scale_ref[...] + shift_ref[...],
                             0.0).astype(o_ref.dtype)


def conv_bn_relu_nhwc(x, w, gamma, beta, *, dilation=1, eps=1e-5,
                      tile_rows=None, out_dtype=None):
    """x: (N, H, W, Cin); w: (3, 3, Cin, Cout) -> (N, H, W, Cout)."""
    n, h, wdt, cin = x.shape
    kh, kw, _, cout = w.shape
    assert kh == 3 and kw == 3, "U2Net's ConvBNReLU uses 3x3 kernels"
    r = dilation                        # module's padding: k//2 if dil==1 else dil
    cp = ((cout + 127) // 128) * 128    # lane-dense channels for the MXU N dim
    out_dtype = x.dtype if out_dtype is None else out_dtype
    hp, wp = h + 2 * r, wdt + 2 * r

    # bf16 MXU operands; accumulation, BN stats and BN math stay in f32.
    x_pad = jnp.pad(x.astype(jnp.bfloat16), ((0, 0), (r, r), (r, r), (0, 0)))
    w_flat = jnp.pad(w.astype(jnp.bfloat16),
                     ((0, 0), (0, 0), (0, 0), (0, cp - cout))).reshape(9 * cin, cp)

    # VMEM budget derived from the device (v5e/v6e 128 MiB, v7x 64 MiB).
    vmem_cap = _vmem_capacity_bytes()
    vmem_limit = min((vmem_cap * 3) // 4, 96 * 1024 * 1024)
    budget = max(vmem_limit - (8 << 20), 8 << 20)

    if tile_rows is None:
        # Audit: double-buffered image + weights (fixed) + per-tile y block,
        # im2col patch/tap slices, f32 acc and deviation temporaries.
        fixed = 2 * hp * wp * cin * 2 + 2 * 9 * cin * cp * 2 + (1 << 16)
        tile_rows = 1
        for tr_c in range(1, h + 1):
            if h % tr_c:
                continue
            per = (2 * tr_c * wdt * cout * 2
                   + 2 * tr_c * wdt * 9 * cin * 2
                   + 2 * tr_c * wdt * cp * 4)
            if fixed + per <= budget:
                tile_rows = tr_c
    assert h % tile_rows == 0, "tile_rows must divide H"
    tiles_per_img = h // tile_rows
    num_tiles = n * tiles_per_img

    conv_flops = 2 * n * h * wdt * 9 * cin * cp
    y, st = pl.pallas_call(
        functools.partial(_conv_stats_kernel, tr=tile_rows, out_w=wdt,
                          dil=dilation, inv_cnt=1.0 / float(tile_rows * wdt)),
        out_shape=(jax.ShapeDtypeStruct((n * h, wdt, cout), jnp.bfloat16),
                   jax.ShapeDtypeStruct((num_tiles, 2, cp), jnp.float32)),
        grid=(n, tiles_per_img),
        in_specs=[
            pl.BlockSpec((1, hp, wp, cin), lambda i, t: (i, 0, 0, 0)),
            pl.BlockSpec((9 * cin, cp), lambda i, t: (0, 0)),
        ],
        out_specs=(
            pl.BlockSpec((tile_rows, wdt, cout),
                         lambda i, t: (i * tiles_per_img + t, 0, 0)),
            pl.BlockSpec((1, 2, cp),
                         lambda i, t: (i * tiles_per_img + t, 0, 0)),
        ),
        compiler_params=pltpu.CompilerParams(
            dimension_semantics=("parallel", "parallel"),
            vmem_limit_bytes=int(vmem_limit)),
        cost_estimate=pl.CostEstimate(
            flops=int(conv_flops), transcendentals=0,
            bytes_accessed=int(n * hp * wp * cin * 2 + 9 * cin * cp * 2
                               + n * h * wdt * cout * 2
                               + num_tiles * 2 * cp * 4)),
    )(x_pad, w_flat)

    # BatchNorm2d (training mode): per-tile (mean, M2) combined with Chan's
    # parallel algorithm (numerically stable), folded into one scale/shift.
    cnt_tile = jnp.float32(tile_rows * wdt)
    means = st[:, 0, :cout]                            # (num_tiles, Cout)
    m2s = st[:, 1, :cout]
    mean = jnp.mean(means, axis=0)
    m2_tot = jnp.sum(m2s, axis=0) + cnt_tile * jnp.sum((means - mean) ** 2,
                                                       axis=0)
    var = m2_tot / jnp.float32(n * h * wdt)            # biased, like BN training
    scale_v = gamma.astype(jnp.float32) * jax.lax.rsqrt(var + eps)
    shift_v = beta.astype(jnp.float32) - mean * scale_v
    scale = scale_v.reshape(1, 1, cout)
    shift = shift_v.reshape(1, 1, cout)

    out_bytes = jnp.dtype(out_dtype).itemsize
    tr2 = _largest_divisor_leq(
        n * h, max(1, budget // (2 * wdt * cout * (2 + out_bytes))))
    out_full = pl.pallas_call(
        _bn_relu_kernel,
        out_shape=jax.ShapeDtypeStruct((n * h, wdt, cout), out_dtype),
        grid=(n * h // tr2,),
        in_specs=[
            pl.BlockSpec((tr2, wdt, cout), lambda i: (i, 0, 0)),
            pl.BlockSpec((1, 1, cout), lambda i: (0, 0, 0)),
            pl.BlockSpec((1, 1, cout), lambda i: (0, 0, 0)),
        ],
        out_specs=pl.BlockSpec((tr2, wdt, cout), lambda i: (i, 0, 0)),
        compiler_params=pltpu.CompilerParams(
            dimension_semantics=("parallel",),
            vmem_limit_bytes=int(vmem_limit)),
        cost_estimate=pl.CostEstimate(
            flops=int(2 * n * h * wdt * cout), transcendentals=0,
            bytes_accessed=int(n * h * wdt * cout * (2 + out_bytes))),
    )(y, scale, shift)

    return out_full.reshape(n, h, wdt, cout)


def conv_bn_relu(x_nchw, w_oihw, gamma, beta, *, dilation=1, tile_rows=None):
    """PyTorch-facing NCHW wrapper around the NHWC Pallas kernels."""
    # TODO(synk): a full-model port would stay NHWC end-to-end; these
    #             transposes exist only for the NCHW test harness.
    x = jnp.transpose(x_nchw, (0, 2, 3, 1))          # NCHW -> NHWC
    w = jnp.transpose(w_oihw, (2, 3, 1, 0))          # OIHW -> (KH, KW, Cin, Cout)
    out = conv_bn_relu_nhwc(x, w, gamma, beta,
                            dilation=dilation, tile_rows=tile_rows)
    return jnp.transpose(out, (0, 3, 1, 2))          # NHWC -> NCHW


if __name__ == "__main__":
    key = jax.random.PRNGKey(0)
    k_x, k_w = jax.random.split(key)

    # Small shapes consistent with the module's forward: NCHW input.
    n, cin, h, w_sp = 2, 4, 16, 16
    cout, k = 8, 3

    x = jax.random.normal(k_x, (n, cin, h, w_sp), jnp.float32)

    # Conv2d-style init (uniform in +-1/sqrt(fan_in)); no bias because
    # norm_layer == nn.BatchNorm2d => use_bias = False.
    fan_in = cin * k * k
    bound = 1.0 / math.sqrt(fan_in)
    w = jax.random.uniform(k_w, (cout, cin, k, k), jnp.float32, -bound, bound)

    # BatchNorm2d init: weight=1, bias=0.
    gamma = jnp.ones((cout,), jnp.float32)
    beta = jnp.zeros((cout,), jnp.float32)

    def reference(x_, w_, dil):
        # Reference on bf16-rounded operands (the kernel feeds the MXU in bf16
        # and stores the conv intermediate in bf16; stats / BN math in f32).
        xr = x_.astype(jnp.bfloat16).astype(jnp.float32)
        wr = w_.astype(jnp.bfloat16).astype(jnp.float32)
        conv = jax.lax.conv_general_dilated(
            xr, wr, window_strides=(1, 1),
            padding=[(dil, dil), (dil, dil)], rhs_dilation=(dil, dil),
            dimension_numbers=("NCHW", "OIHW", "NCHW"))
        m = conv.mean(axis=(0, 2, 3), keepdims=True)
        v = ((conv - m) ** 2).mean(axis=(0, 2, 3), keepdims=True)
        y_ = (conv - m) * jax.lax.rsqrt(v + 1e-5)
        y_ = y_ * gamma.reshape(1, -1, 1, 1) + beta.reshape(1, -1, 1, 1)
        return jnp.maximum(y_, 0.0)

    # Standard ConvBNReLU (dilation=1), two row-tiles per image.
    out1 = conv_bn_relu(x, w, gamma, beta, dilation=1, tile_rows=8)
    jax.block_until_ready(out1)
    assert out1.shape == (n, cout, h, w_sp)
    assert jnp.allclose(out1, reference(x, w, 1), atol=3e-2, rtol=3e-2), \
        "mismatch vs reference (dilation=1)"

    # Dilated variant used inside RSU / RSU4F blocks.
    out2 = conv_bn_relu(x, w, gamma, beta, dilation=2, tile_rows=4)
    jax.block_until_ready(out2)
    assert out2.shape == (n, cout, h, w_sp)
    assert jnp.allclose(out2, reference(x, w, 2), atol=3e-2, rtol=3e-2), \
        "mismatch vs reference (dilation=2)"

    # Auto tile-size heuristic path (whole image in one row-tile).
    out3 = conv_bn_relu(x, w, gamma, beta, dilation=1)
    jax.block_until_ready(out3)
    assert out3.shape == (n, cout, h, w_sp)
    assert jnp.allclose(out3, reference(x, w, 1), atol=3e-2, rtol=3e-2), \
        "mismatch vs reference (auto tiling)"

    print("KERNEL_OK")
</pallas_src>

<mosaic_0001>
module attributes {stable_mosaic.version = 11 : i64} {
  func.func @_conv_stats_kernel(%arg0: i32, %arg1: i32, %arg2: memref<1x18x18x4xbf16, #tpu.memory_space<vmem>>, %arg3: memref<36x128xbf16, #tpu.memory_space<vmem>>, %arg4: memref<8x16x8xbf16, #tpu.memory_space<vmem>>, %arg5: memref<1x2x128xf32, #tpu.memory_space<vmem>>) attributes {dimension_semantics = [#tpu.dimension_semantics<parallel>, #tpu.dimension_semantics<parallel>], iteration_bounds = array<i64: 2, 2>, scalar_prefetch = 0 : i64, scratch_operands = 0 : i64, tpu.core_type = #tpu.core_type<tc>, window_params = [{transform_indices = @transform_0, window_bounds = array<i64: 1, 18, 18, 4>}, {pipeline_mode = #tpu.pipeline_mode<synchronous>, transform_indices = @transform_1, window_bounds = array<i64: 36, 128>}, {transform_indices = @transform_2, window_bounds = array<i64: 8, 16, 8>}, {transform_indices = @transform_3, window_bounds = array<i64: 1, 2, 128>}]} {
    %c8_i32 = arith.constant 8 : i32
    %0 = arith.muli %arg1, %c8_i32 : i32
    %1 = tpu.assume_multiple %0, 8 : i32
    %c0_i32 = arith.constant 0 : i32
    %2 = arith.addi %1, %c0_i32 : i32
    %c0 = arith.constant 0 : index
    %3 = arith.index_cast %2 : i32 to index
    %c0_0 = arith.constant 0 : index
    %c0_1 = arith.constant 0 : index
    %4 = vector.load %arg2[%c0, %3, %c0_0, %c0_1] : memref<1x18x18x4xbf16, #tpu.memory_space<vmem>>, vector<1x8x16x4xbf16>
    %5 = vector.shape_cast %4 : vector<1x8x16x4xbf16> to vector<8x16x4xbf16>
    %c0_i32_2 = arith.constant 0 : i32
    %6 = arith.addi %1, %c0_i32_2 : i32
    %c0_3 = arith.constant 0 : index
    %7 = arith.index_cast %6 : i32 to index
    %c1 = arith.constant 1 : index
    %c0_4 = arith.constant 0 : index
    %8 = vector.load %arg2[%c0_3, %7, %c1, %c0_4] : memref<1x18x18x4xbf16, #tpu.memory_space<vmem>>, vector<1x8x16x4xbf16>
    %9 = vector.shape_cast %8 : vector<1x8x16x4xbf16> to vector<8x16x4xbf16>
    %c0_i32_5 = arith.constant 0 : i32
    %10 = arith.addi %1, %c0_i32_5 : i32
    %c0_6 = arith.constant 0 : index
    %11 = arith.index_cast %10 : i32 to index
    %c2 = arith.constant 2 : index
    %c0_7 = arith.constant 0 : index
    %12 = vector.load %arg2[%c0_6, %11, %c2, %c0_7] : memref<1x18x18x4xbf16, #tpu.memory_space<vmem>>, vector<1x8x16x4xbf16>
    %13 = vector.shape_cast %12 : vector<1x8x16x4xbf16> to vector<8x16x4xbf16>
    %c1_i32 = arith.constant 1 : i32
    %14 = arith.addi %1, %c1_i32 : i32
    %c0_8 = arith.constant 0 : index
    %15 = arith.index_cast %14 : i32 to index
    %c0_9 = arith.constant 0 : index
    %c0_10 = arith.constant 0 : index
    %16 = vector.load %arg2[%c0_8, %15, %c0_9, %c0_10] : memref<1x18x18x4xbf16, #tpu.memory_space<vmem>>, vector<1x8x16x4xbf16>
    %17 = vector.shape_cast %16 : vector<1x8x16x4xbf16> to vector<8x16x4xbf16>
    %c1_i32_11 = arith.constant 1 : i32
    %18 = arith.addi %1, %c1_i32_11 : i32
    %c0_12 = arith.constant 0 : index
    %19 = arith.index_cast %18 : i32 to index
    %c1_13 = arith.constant 1 : index
    %c0_14 = arith.constant 0 : index
    %20 = vector.load %arg2[%c0_12, %19, %c1_13, %c0_14] : memref<1x18x18x4xbf16, #tpu.memory_space<vmem>>, vector<1x8x16x4xbf16>
    %21 = vector.shape_cast %20 : vector<1x8x16x4xbf16> to vector<8x16x4xbf16>
    %c1_i32_15 = arith.constant 1 : i32
    %22 = arith.addi %1, %c1_i32_15 : i32
    %c0_16 = arith.constant 0 : index
    %23 = arith.index_cast %22 : i32 to index
    %c2_17 = arith.constant 2 : index
    %c0_18 = arith.constant 0 : index
    %24 = vector.load %arg2[%c0_16, %23, %c2_17, %c0_18] : memref<1x18x18x4xbf16, #tpu.memory_space<vmem>>, vector<1x8x16x4xbf16>
    %25 = vector.shape_cast %24 : vector<1x8x16x4xbf16> to vector<8x16x4xbf16>
    %c2_i32 = arith.constant 2 : i32
    %26 = arith.addi %1, %c2_i32 : i32
    %c0_19 = arith.constant 0 : index
    %27 = arith.index_cast %26 : i32 to index
    %c0_20 = arith.constant 0 : index
    %c0_21 = arith.constant 0 : index
    %28 = vector.load %arg2[%c0_19, %27, %c0_20, %c0_21] : memref<1x18x18x4xbf16, #tpu.memory_space<vmem>>, vector<1x8x16x4xbf16>
    %29 = vector.shape_cast %28 : vector<1x8x16x4xbf16> to vector<8x16x4xbf16>
    %c2_i32_22 = arith.constant 2 : i32
    %30 = arith.addi %1, %c2_i32_22 : i32
    %c0_23 = arith.constant 0 : index
    %31 = arith.index_cast %30 : i32 to index
    %c1_24 = arith.constant 1 : index
    %c0_25 = arith.constant 0 : index
    %32 = vector.load %arg2[%c0_23, %31, %c1_24, %c0_25] : memref<1x18x18x4xbf16, #tpu.memory_space<vmem>>, vector<1x8x16x4xbf16>
    %33 = vector.shape_cast %32 : vector<1x8x16x4xbf16> to vector<8x16x4xbf16>
    %c2_i32_26 = arith.constant 2 : i32
    %34 = arith.addi %1, %c2_i32_26 : i32
    %c0_27 = arith.constant 0 : index
    %35 = arith.index_cast %34 : i32 to index
    %c2_28 = arith.constant 2 : index
    %c0_29 = arith.constant 0 : index
    %36 = vector.load %arg2[%c0_27, %35, %c2_28, %c0_29] : memref<1x18x18x4xbf16, #tpu.memory_space<vmem>>, vector<1x8x16x4xbf16>
    %37 = vector.shape_cast %36 : vector<1x8x16x4xbf16> to vector<8x16x4xbf16>
    %38 = tpu.concatenate %5, %9, %13, %17, %21, %25, %29, %33, %37 in 2 : vector<8x16x4xbf16>, vector<8x16x4xbf16>, vector<8x16x4xbf16>, vector<8x16x4xbf16>, vector<8x16x4xbf16>, vector<8x16x4xbf16>, vector<8x16x4xbf16>, vector<8x16x4xbf16>, vector<8x16x4xbf16> -> vector<8x16x36xbf16>
    %39 = vector.shape_cast %38 : vector<8x16x36xbf16> to vector<128x36xbf16>
    %c0_30 = arith.constant 0 : index
    %c0_31 = arith.constant 0 : index
    %40 = vector.load %arg3[%c0_30, %c0_31] : memref<36x128xbf16, #tpu.memory_space<vmem>>, vector<36x128xbf16>
    %cst = arith.constant dense<0.000000e+00> : vector<128x128xf32>
    %41 = tpu.matmul %39, %40, %cst {dimension_numbers = #tpu.dot_dimension_numbers<[1], [0], [0], [1], [0, 0, 1, 1], [], []>} : vector<128x36xbf16>, vector<36x128xbf16>, vector<128x128xf32> -> vector<128x128xf32>
    %42 = vector.extract_strided_slice %41 {offsets = [0, 0], sizes = [128, 8], strides = [1, 1]} : vector<128x128xf32> to vector<128x8xf32>
    %43 = vector.shape_cast %42 : vector<128x8xf32> to vector<8x16x8xf32>
    %44 = arith.truncf %43 : vector<8x16x8xf32> to vector<8x16x8xbf16>
    %c0_32 = arith.constant 0 : index
    %c0_33 = arith.constant 0 : index
    %c0_34 = arith.constant 0 : index
    %45 = vector.load %arg4[%c0_32, %c0_33, %c0_34] : memref<8x16x8xbf16, #tpu.memory_space<vmem>>, vector<8x16x8xbf16>
    tpu.vector_store %arg4[%c0_32, %c0_33, %c0_34], %44 {strides = array<i32>} : memref<8x16x8xbf16, #tpu.memory_space<vmem>>, vector<8x16x8xbf16>,
    %cst_35 = arith.constant dense<0.000000e+00> : vector<128xf32>
    %46 = vector.multi_reduction <add>, %41, %cst_35 [0] : vector<128x128xf32> to vector<128xf32>
    %47 = vector.shape_cast %46 : vector<128xf32> to vector<1x128xf32>
    %cst_36 = arith.constant 7.812500e-03 : f32
    %48 = vector.broadcast %cst_36 : f32 to vector<1x128xf32>
    %49 = arith.mulf %47, %48 : vector<1x128xf32>
    %50 = vector.broadcast %49 : vector<1x128xf32> to vector<128x128xf32>
    %51 = arith.subf %41, %50 : vector<128x128xf32>
    %52 = arith.mulf %51, %51 : vector<128x128xf32>
    %cst_37 = arith.constant dense<0.000000e+00> : vector<128xf32>
    %53 = vector.multi_reduction <add>, %52, %cst_37 [0] : vector<128x128xf32> to vector<128xf32>
    %54 = vector.shape_cast %53 : vector<128xf32> to vector<1x128xf32>
    %55 = tpu.concatenate %49, %54 in 0 : vector<1x128xf32>, vector<1x128xf32> -> vector<2x128xf32>
    %56 = vector.shape_cast %55 : vector<2x128xf32> to vector<1x2x128xf32>
    %c0_38 = arith.constant 0 : index
    %c0_39 = arith.constant 0 : index
    %c0_40 = arith.constant 0 : index
    %57 = vector.load %arg5[%c0_38, %c0_39, %c0_40] : memref<1x2x128xf32, #tpu.memory_space<vmem>>, vector<1x2x128xf32>
    tpu.vector_store %arg5[%c0_38, %c0_39, %c0_40], %56 {strides = array<i32>} : memref<1x2x128xf32, #tpu.memory_space<vmem>>, vector<1x2x128xf32>,
    return
  }
  func.func @transform_0(%arg0: i32, %arg1: i32) -> (i32, i32, i32, i32) {
    %c0_i32 = arith.constant 0 : i32
    %c0_i32_0 = arith.constant 0 : i32
    %c0_i32_1 = arith.constant 0 : i32
    %c0_i32_2 = arith.constant 0 : i32
    return %arg0, %c0_i32, %c0_i32_0, %c0_i32_1 : i32, i32, i32, i32
  }
  func.func @transform_1(%arg0: i32, %arg1: i32) -> (i32, i32) {
    %c0_i32 = arith.constant 0 : i32
    %c0_i32_0 = arith.constant 0 : i32
    %c0_i32_1 = arith.constant 0 : i32
    return %c0_i32, %c0_i32_0 : i32, i32
  }
  func.func @transform_2(%arg0: i32, %arg1: i32) -> (i32, i32, i32) {
    %c2_i32 = arith.constant 2 : i32
    %0 = arith.muli %arg0, %c2_i32 : i32
    %1 = arith.addi %0, %arg1 : i32
    %c0_i32 = arith.constant 0 : i32
    %c0_i32_0 = arith.constant 0 : i32
    %c0_i32_1 = arith.constant 0 : i32
    return %1, %c0_i32, %c0_i32_0 : i32, i32, i32
  }
  func.func @transform_3(%arg0: i32, %arg1: i32) -> (i32, i32, i32) {
    %c2_i32 = arith.constant 2 : i32
    %0 = arith.muli %arg0, %c2_i32 : i32
    %1 = arith.addi %0, %arg1 : i32
    %c0_i32 = arith.constant 0 : i32
    %c0_i32_0 = arith.constant 0 : i32
    %c0_i32_1 = arith.constant 0 : i32
    return %1, %c0_i32, %c0_i32_0 : i32, i32, i32
  }
}

</mosaic_0001>

<bundles_post_ra>
// kernel: tpu_custom_call.1
= control target key start
LH: loop header
LB: loop body
LE: loop exit
PB: predicated region body
PF: predicated region fallthrough
CT: control target
= control target key end

     0   :  { %9 = vsyncpa [#allocation3], 0  ;;  %s2840_s0 = inlined_call_operand.vmem [shape: bf16[2,18,18,4], index: 0, kind: input, shape index: {}]   ;;  %s2841_s1 = inlined_call_operand.vmem [shape: bf16[36,128], index: 1, kind: input, shape index: {}]   ;;  %s2842_s2 = inlined_call_operand.vmem [shape: bf16[32,16,8], index: 2, kind: output, shape index: {0}]   ;;  %s2843_s3 = inlined_call_operand.hbm [shape: f32[4,2,128], index: 3, kind: output, shape index: {1}]  }
   0x1   :  { %11 = vsyncpa [#allocation3 + $0x1], 0  ;;  %s2176_s12 = smov 0   ;;  %s2178_s13 = smov 0  }
   0x2   :  { %s2180_s14 = smov 0   ;;  %s2182_s15 = smov 0  }
   0x3   :  { %s2184_s16 = smov 0   ;;  %s2186_s17 = smov 0  }
   0x4   :  { %s2188_s18 = smov 0   ;;  %s2190_s19 = smov 0  }
   0x5 LB: > { %s1649_s20 = sadd.s32 4294967295, %s2145_s19   ;;  %s26_s21 = sadd.s32 1, %s2137_s17  ;;  %s2145_s19 = sphi %s2190_s19, %s17_s19   ;;  %s2141_s18 = sphi %s2188_s18, %s2852_s18   ;;  %s2137_s17 = sphi %s2186_s17, %s2851_s17   ;;  %s2133_s16 = sphi %s2184_s16, %s2850_s16   ;;  %s2129_s15 = sphi %s2182_s15, %s2849_s15   ;;  %s2125_s14 = sphi %s2180_s14, %s2848_s14   ;;  %s2121_s13 = sphi %s2178_s13, %s2847_s13   ;;  %s2117_s12 = sphi %s2176_s12, %s2846_s12  }
   0x6   : > { %s29_s22 = sadd.s32 1, %s2141_s18  ;;  %p27_p0 = scmp.ge.s32.totalorder %s26_s21, 2 }
   0x7   : > { %s1653_s23 = sshll.u32 %s2141_s18, 1  ;;  %s1650_s24 = sadd.s32 4294967294, %s2145_s19  }
   0x8   : > { %s111_s25 = sadd.s32 %s2137_s17, %s1653_s23  ;;  %s2854_s21 = smov (%p27_p0, %s26_s21), 0 }
   0x9   : > { %s2856_s22 = smov (!%p27_p0, %s29_s22), %s2141_s18  ;;  %p127_p1 = scmp.ne.s32.totalorder %s2125_s14, %s2121_s13 }
   0xa   : > { %p128_p2 = scmp.eq.s32.totalorder %s1649_s20, 3  ;;  %p31_p3 = scmp.ge.s32.totalorder %s2856_s22, 2 }
   0xb   : > { %p133_p4 = scmp.ne.s32.totalorder %s2121_s13, %s2117_s12  ;;  %p134_p6 = scmp.eq.s32.totalorder %s1650_s24, 3 }
   0xc   : > { %p2229_p5 = por %p128_p2, %p127_p1  ;;  %s2858_s22 = smov (%p31_p3, %s2856_s22), 0 }
   0xd   : > { %p2235_p7 = por %p134_p6, %p133_p4  ;;  %p1657_p8 = scmp.ge.s32.totalorder %s2145_s19, 1 }
   0xe   : > { %s1654_s28 = sshll.u32 %s2858_s22, 1  ;;  %p163_p9 = scmp.lt.s32.totalorder %s2145_s19, 5 }
   0xf   : > { %s113_s29 = sadd.s32 %s1654_s28, %s2854_s21  ;;  %s117_s30 = sadd.s32 1, %s2125_s14 }
  0x10   : > { %s114_s4 = ssub.s32 %s111_s25, %s113_s29  ;;  %p164_p10 = pnand %p1657_p8, %p163_p9 }
  0x11   : > { %p115_p11 = scmp.eq.s32.totalorder %s114_s4, 0  ;;  %p195_p12 = scmp.lt.s32.totalorder (!%p164_p10), %s2133_s16, 1 }
  0x12   : > { %167 = sbr.rel (%p164_p10) target bundleno = 556 (0x22c), region = 28  ;;  %s2147_s23 = smov (!%p164_p10), 12  }
  0x13   : > { %s2245_s5 = scalar_select %p115_p11, %s2125_s14, %s117_s30  }
  0x14   : > { %s1840_s7 = smul.u32 (!%p164_p10), 96, %s2129_s15  ;;  %s2148_s24 = smov (!%p164_p10), 20  }
  0x15   : > { %s2149_s25 = smov (!%p164_p10), 8   ;;  %s2150_s28 = smov (!%p164_p10), 4  }
  0x16   : > { %s2151_s29 = smov (!%p164_p10), 16   ;;  %s2152_s30 = smov (!%p164_p10), 24  }
  0x17   : > { %s196_s6 = scalar_select %p195_p12, %s2133_s16, 1  ;;  %vm523_vm0 = vcmask 1046528   ;;  %vm386_vm1 = vsmask.f32 7424  ;;  %vm1249_vm2 = vcmask 1041408   ;;  %vm1076_vm3 = vcmask 31744  }
  0x18   : > { %s2153_s4 = smov 28   ;;  %vm1093_vm4 = vcmask 64512   ;;  %vm1110_vm5 = vcmask 97280   ;;  %vm1127_vm6 = vcmask 130048   ;;  %vm1144_vm7 = vcmask 162816  }
  0x19   : > { %s1898_s8 = smul.u32 216, %s196_s6  ;;  %s2154_s6 = smov 32   ;;  %vm1161_vm8 = vcmask 195584   ;;  %vm1178_vm9 = vcmask 228352   ;;  %vm1195_vm10 = vcmask 261120   ;;  %vm1232_vm11 = vcmask 293888  }
  0x1a   : > { %vm1414_vm12 = vcmask 60416   ;;  %vm1506_vm13 = vcmask 1040384  }
  0x1b   : > { %s199_s11 = scalar_lea.vmem %s2840_s0, %s1898_s8 }
  0x1c   : > { %s2253_s20 = scalar_lea.vmem %s199_s11, %s1840_s7 }
  0x1d   : > { %v1671_v0 = vld [vmem:[%s2253_s20 + $0x18] sm:$0xf]  ;;  %v1672_v1 = vld [vmem:[%s2253_s20 + $0x1c] sm:$0xf]  ;;  %v1669_v5 = vld [vmem:[%s2253_s20 + $0xc] sm:$0xf] }
  0x1e   : > { %v1694_v2 = vld [vmem:[%s2253_s20 + $0x18] sm:$0xe]  ;;  %v2258_v3 = vcombine.low %v1671_v0, %v1672_v1  ;;  %v1670_v6 = vld [vmem:[%s2253_s20 + $0x10] sm:$0xf]  ;;  %v1693_v7 = vld [vmem:[%s2253_s20 + $0xc] sm:$0xe] }
  0x1f   : > { %v1776_v4 = vcombine.low %v1694_v2, %v1672_v1  ;;  %v2263_v8 = vcombine.low %v1669_v5, %v1670_v6  ;;  %v1775_v9 = vcombine.low %v1693_v7, %v1670_v6  ;;  %v2266_v10 = vld [vmem:[%s2253_s20 + $0x14] ss:$0 sps:$4 sm:$0x11]   ;;  %v219_v12 = vld [vmem:[%s2253_s20 + $0x4] sm:$0xf] }
  0x20   : > { %606 = vrot.lane.b32.xlu1 %v2258_v3, %s2147_s23  ;;  %v659_v11 = vshll.u32 %v2258_v3, 16  ;;  %v781_v15 = vrot.slane %v2266_v10, 1  ;;  %v242_v16 = vld [vmem:[%s2253_s20] sm:$0xe]  ;;  %v657_v21 = vshrl.u32 %v2258_v3, 16  ;;  %v652_v59 = vshll.u32 %v2266_v10, 16 }
  0x21   : > { %604 = vrot.lane.b32.xlu0 %v2263_v8, %s2147_s23  ;;  %v647_v13 = vshll.u32 %v2263_v8, 16  ;;  %v780_v14 = vrot.slane %v1775_v9, 1  ;;  %v783_v17 = vrot.slane %v1776_v4, 1  ;;  %v1983_v18 = vld [vmem:[%s2253_s20 + $0x8] ss:$0 sps:$4 sm:$0x11]   ;;  %v1751_v19 = vcombine.low %v242_v16, %v219_v12 }
  0x22   : > { %v218_v20 = vld [vmem:[%s2253_s20] sm:$0xf]  ;;  %v220_v24 = vld [vmem:[%s2253_s20 + $0xc] sm:$0xf]  ;;  %v221_v25 = vld [vmem:[%s2253_s20 + $0x10] sm:$0xf] }
  0x23   : > { %v782_v22 = vsel %vm523_vm0, %v780_v14, %v781_v15  ;;  %v2281_v23 = vcombine.low %v218_v20, %v219_v12  ;;  %v524_v26 = vrot.slane %v1751_v19, 1  ;;  %v525_v27 = vrot.slane %v1983_v18, 1  ;;  %v243_v28 = vld [vmem:[%s2253_s20 + $0xc] sm:$0xe]  ;;  %v1705_v43 = vld [vmem:[%s2253_s20 + $0x24] sm:$0xf] }
  0x24   : > { %v2286_v29 = vcombine.low %v220_v24, %v221_v25  ;;  %v395_v30 = vshll.u32 %v1983_v18, 16  ;;  %v1987_v31 = vld [vmem:[%s2253_s20 + $0x14] ss:$0 sps:$4 sm:$0x11]   ;;  %v1752_v32 = vcombine.low %v243_v28, %v221_v25  ;;  %v661_v35 = vrot.slane %v659_v11, 1 }
  0x25   : > { %804 = vrot.lane.b32.xlu0 %v782_v22, %s2148_s24  ;;  %v388_v33 = vshrl.u32 %v2281_v23, 16  ;;  %v390_v34 = vshll.u32 %v2281_v23, 16  ;;  %v526_v36 = vsel %vm523_vm0, %v524_v26, %v525_v27  ;;  %v1989_v38 = vld [vmem:[%s2253_s20 + $0x20] ss:$0 sps:$4 sm:$0x11]   ;;  %v528_v40 = vrot.slane %v1987_v31, 1 }
  0x26   : > { %v397_v37 = vrot.slane %v395_v30, 1  ;;  %548 = vrot.lane.b32.xlu1 %v526_v36, %s2149_s25  ;;  %v527_v39 = vrot.slane %v1752_v32, 1  ;;  %v400_v42 = vshrl.u32 %v2286_v29, 16  ;;  %v784_v44 = vrot.slane %v1989_v38, 1  ;;  %v2299_v48 = vld [vmem:[%s2253_s20 + $0x28] sm:$0xf] }
  0x27   : > { %v392_v41 = vrot.slane %v390_v34, 1  ;;  %v402_v45 = vshll.u32 %v2286_v29, 16  ;;  %v407_v46 = vshll.u32 %v1987_v31, 16  ;;  %v664_v47 = vshll.u32 %v1989_v38, 16  ;;  %v1703_v53 = vld [vmem:[%s2253_s20 + $0x18] sm:$0xf] }
  0x28   : > { %v529_v49 = vsel %vm523_vm0, %v527_v39, %v528_v40  ;;  %v645_v51 = vshrl.u32 %v2263_v8, 16  ;;  %v649_v52 = vrot.slane %v647_v13, 1  ;;  %v1704_v56 = vld [vmem:[%s2253_s20 + $0x1c] sm:$0xf]  ;;  %v662_v58 = vor.u32 %v661_v35, %v657_v21  ;;  %v1727_v7 = vld [vmem:[%s2253_s20 + $0x18] sm:$0xe] }
  0x29   : > { %v393_v50 = vor.u32 %v392_v41, %v388_v33  ;;  %v404_v54 = vrot.slane %v402_v45, 1  ;;  %v409_v55 = vrot.slane %v407_v46, 1  ;;  %v1784_v60 = vcombine.low %v1705_v43, %v2299_v48  ;;  %v2312_v1 = vld [vmem:[%s2253_s20 + $0x2c] ss:$0 sps:$4 sm:$0x11]  }
  0x2a   : > { %550 = vrot.lane.b32.xlu1 %v529_v49, %s2149_s25  ;;  %v785_v61 = vsel %vm523_vm0, %v783_v17, %v784_v44  ;;  %v666_v63 = vrot.slane %v664_v47, 1  ;;  %v1783_v0 = vcombine.low %v1703_v53, %v1704_v56  ;;  %v650_v2 = vor.u32 %v649_v52, %v645_v51  ;;  %v1995_v5 = vld [vmem:[%s2253_s20 + $0x20] ss:$0 sps:$4 sm:$0x11]   ;;  %v222_v10 = vld [vmem:[%s2253_s20 + $0x18] sm:$0xf] }
  0x2b   : > { %v398_v57 = vsel %vm386_vm1, %v393_v50, %v397_v37  ;;  %v405_v62 = vor.u32 %v404_v54, %v400_v42  ;;  %v654_v3 = vrot.slane %v652_v59, 1  ;;  %v915_v4 = vshll.u32 %v1784_v60, 16  ;;  %v2321_v13 = vld [vmem:[%s2253_s20 + $0x1c] sm:$0xf]  ;;  %v224_v21 = vld [vmem:[%s2253_s20 + $0x24] sm:$0xf] }
  0x2c   : > { %483 = vrot.lane.b32.xlu0 %v398_v57, %s2150_s28  ;;  %v903_v8 = vshll.u32 %v1783_v0, 16  ;;  %v913_v9 = vshrl.u32 %v1784_v60, 16  ;;  %v920_v12 = vshll.u32 %v2312_v1, 16  ;;  %v667_v14 = vsel %vm386_vm1, %v662_v58, %v666_v63  ;;  %v2329_v17 = vld [vmem:[%s2253_s20 + $0x20] ss:$0 sps:$4 sm:$0x11]  }
  0x2d   : > { %v410_v6 = vsel %vm386_vm1, %v405_v62, %v409_v55  ;;  %v917_v11 = vrot.slane %v915_v4, 1  ;;  %v901_v15 = vshrl.u32 %v1783_v0, 16  ;;  %v2326_v16 = vcombine.low %v222_v10, %v2321_v13  ;;  %v225_v22 = vld [vmem:[%s2253_s20 + $0x28] sm:$0xf]  ;;  %v1728_v37 = vld [vmem:[%s2253_s20 + $0x24] sm:$0xe] }
  0x2e   : > { %806 = vrot.lane.b32.xlu1 %v785_v61, %s2148_s24  ;;  %v655_v18 = vsel %vm386_vm1, %v650_v2, %v654_v3  ;;  %v905_v19 = vrot.slane %v903_v8, 1  ;;  %v908_v20 = vshll.u32 %v1995_v5, 16  ;;  %v1799_v24 = vcombine.low %v1727_v7, %v1704_v56  ;;  %v1999_v33 = vld [vmem:[%s2253_s20 + $0x2c] ss:$0 sps:$4 sm:$0x11]  }
  0x2f   : > { %v414_v25 = vshll.u32 %v2326_v16, 16  ;;  %v918_v26 = vor.u32 %v917_v11, %v913_v9  ;;  %v922_v27 = vrot.slane %v920_v12, 1  ;;  %v419_v28 = vshll.u32 %v2329_v17, 16  ;;  %v245_v42 = vld [vmem:[%s2253_s20 + $0x24] sm:$0xe] }
  0x30   : > { %485 = vrot.lane.b32.xlu0 %v410_v6, %s2150_s28  ;;  %v2337_v30 = vcombine.low %v224_v21, %v225_v22  ;;  %v412_v31 = vshrl.u32 %v2326_v16, 16  ;;  %v906_v34 = vor.u32 %v905_v19, %v901_v15  ;;  %v910_v35 = vrot.slane %v908_v20, 1  ;;  %v244_v47 = vld [vmem:[%s2253_s20 + $0x18] sm:$0xe]  ;;  %v1675_v51 = vld [vmem:[%s2253_s20 + $0x30] sm:$0xf] }
  0x31   : > { %v416_v32 = vrot.slane %v414_v25, 1  ;;  %v923_v38 = vsel %vm386_vm1, %v918_v26, %v922_v27  ;;  %v421_v39 = vrot.slane %v419_v28, 1  ;;  %v1036_v40 = vrot.slane %v1799_v24, 1  ;;  %v1676_v52 = vld [vmem:[%s2253_s20 + $0x34] sm:$0xf] }
  0x32   : > { %742 = vrot.lane.b32.xlu1 %v667_v14, %s2151_s29  ;;  %v426_v36 = vshll.u32 %v2337_v30, 16  ;;  %v1037_v41 = vrot.slane %v1995_v5, 1  ;;  %v424_v44 = vshrl.u32 %v2337_v30, 16  ;;  %v431_v46 = vshll.u32 %v1999_v33, 16  ;;  %v1673_v53 = vld [vmem:[%s2253_s20 + $0x24] sm:$0xf] }
  0x33   : > { %v417_v43 = vor.u32 %v416_v32, %v412_v31  ;;  %v1800_v49 = vcombine.low %v1728_v37, %v2299_v48  ;;  %v911_v50 = vsel %vm386_vm1, %v906_v34, %v910_v35  ;;  %v1674_v54 = vld [vmem:[%s2253_s20 + $0x28] sm:$0xf]  ;;  %v1754_v56 = vcombine.low %v245_v42, %v225_v22  ;;  %v2007_v9 = vld [vmem:[%s2253_s20 + $0x2c] ss:$0 sps:$4 sm:$0x11]  }
  0x34   : > { %740 = vrot.lane.b32.xlu0 %v655_v18, %s2151_s29  ;;  %v428_v45 = vrot.slane %v426_v36, 1  ;;  %v1038_v55 = vsel %vm523_vm0, %v1036_v40, %v1037_v41  ;;  %v433_v59 = vrot.slane %v431_v46, 1  ;;  %v1762_v48 = vcombine.low %v1675_v51, %v1676_v52  ;;  %v1696_v10 = vld [vmem:[%s2253_s20 + $0x30] sm:$0xe]  ;;  %v1695_v11 = vld [vmem:[%s2253_s20 + $0x24] sm:$0xe] }
  0x35   : > { %v422_v57 = vsel %vm386_vm1, %v417_v43, %v421_v39  ;;  %v1040_v61 = vrot.slane %v2312_v1, 1  ;;  %v1753_v62 = vcombine.low %v244_v47, %v2321_v13  ;;  %v1761_v63 = vcombine.low %v1673_v53, %v1674_v54  ;;  %v1709_v19 = vld [vmem:[%s2253_s20 + $0x3c] sm:$0xf]  ;;  %v2379_v20 = vld [vmem:[%s2253_s20 + $0x40] sm:$0xf] }
  0x36   : > { %862 = vrot.lane.b32.xlu1 %v1784_v60, %s2152_s30  ;;  %v429_v58 = vor.u32 %v428_v45, %v424_v44  ;;  %v1039_v60 = vrot.slane %v1800_v49, 1  ;;  %v533_v3 = vrot.slane %v1754_v56, 1  ;;  %v534_v4 = vrot.slane %v1999_v33, 1  ;;  %v1707_v24 = vld [vmem:[%s2253_s20 + $0x30] sm:$0xf] }
  0x37   : > { %v683_v5 = vshll.u32 %v1762_v48, 16  ;;  %v530_v6 = vrot.slane %v1753_v62, 1  ;;  %v531_v7 = vrot.slane %v2329_v17, 1  ;;  %v671_v8 = vshll.u32 %v1761_v63, 16  ;;  %v1708_v25 = vld [vmem:[%s2253_s20 + $0x34] sm:$0xf] }
  0x38   : > { %860 = vrot.lane.b32.xlu0 %v1783_v0, %s2152_s30  ;;  %v2364_v0 = vld [vmem:[%s2253_s20 + $0x38] ss:$0 sps:$4 sm:$0x11]   ;;  %v434_v2 = vsel %vm386_vm1, %v429_v58, %v433_v59  ;;  %v1041_v1 = vsel %vm523_vm0, %v1039_v60, %v1040_v61  ;;  %v681_v12 = vshrl.u32 %v1762_v48, 16  ;;  %v535_v14 = vsel %vm523_vm0, %v533_v3, %v534_v4  ;;  %v226_v36 = vld [vmem:[%s2253_s20 + $0x30] sm:$0xf] }
  0x39   : > { %v688_v13 = vshll.u32 %v2364_v0, 16  ;;  %v685_v15 = vrot.slane %v683_v5, 1  ;;  %v669_v18 = vshrl.u32 %v1761_v63, 16  ;;  %v532_v17 = vsel %vm523_vm0, %v530_v6, %v531_v7  ;;  %v2389_v37 = vld [vmem:[%s2253_s20 + $0x34] sm:$0xf] }
  0x3a   : > { %998 = vrot.lane.b32.xlu1 %v923_v38, %s2153_s4  ;;  %v673_v21 = vrot.slane %v671_v8, 1  ;;  %v676_v22 = vshll.u32 %v2007_v9, 16  ;;  %v1778_v26 = vcombine.low %v1696_v10, %v1676_v52  ;;  %v1777_v27 = vcombine.low %v1695_v11, %v1674_v54  ;;  %v2394_v43 = vld [vmem:[%s2253_s20 + $0x44] ss:$0 sps:$4 sm:$0x11]  }
  0x3b   : > { %v1786_v28 = vcombine.low %v1709_v19, %v2379_v20  ;;  %v686_v31 = vor.u32 %v685_v15, %v681_v12  ;;  %v690_v32 = vrot.slane %v688_v13, 1  ;;  %v1785_v33 = vcombine.low %v1707_v24, %v1708_v25  ;;  %v2013_v46 = vld [vmem:[%s2253_s20 + $0x38] ss:$0 sps:$4 sm:$0x11]   ;;  %v229_v51 = vld [vmem:[%s2253_s20 + $0x40] sm:$0xf] }
  0x3c   : > { %996 = vrot.lane.b32.xlu0 %v911_v50, %s2153_s4  ;;  %v674_v34 = vor.u32 %v673_v21, %v669_v18  ;;  %v678_v35 = vrot.slane %v676_v22, 1  ;;  %v789_v38 = vrot.slane %v1778_v26, 1  ;;  %v790_v39 = vrot.slane %v2364_v0, 1  ;;  %v228_v50 = vld [vmem:[%s2253_s20 + $0x3c] sm:$0xf] }
  0x3d   : > { %v786_v40 = vrot.slane %v1777_v27, 1  ;;  %v787_v41 = vrot.slane %v2007_v9, 1  ;;  %v939_v42 = vshll.u32 %v1786_v28, 16  ;;  %v691_v44 = vsel %vm386_vm1, %v686_v31, %v690_v32  ;;  %v2017_v6 = vld [vmem:[%s2253_s20 + $0x44] ss:$0 sps:$4 sm:$0x11]  }
  0x3e   : > { %487 = vrot.lane.b32.xlu1 %v422_v57, %s2150_s28  ;;  %v927_v45 = vshll.u32 %v1785_v33, 16  ;;  %v2400_v47 = vcombine.low %v226_v36, %v2389_v37  ;;  %v679_v49 = vsel %vm386_vm1, %v674_v34, %v678_v35  ;;  %v937_v52 = vshrl.u32 %v1786_v28, 16  ;;  %v1729_v57 = vld [vmem:[%s2253_s20 + $0x30] sm:$0xe]  ;;  %v247_v21 = vld [vmem:[%s2253_s20 + $0x3c] sm:$0xe] }
  0x3f   : > { %v941_v53 = vrot.slane %v939_v42, 1  ;;  %v944_v54 = vshll.u32 %v2394_v43, 16  ;;  %v791_v56 = vsel %vm523_vm0, %v789_v38, %v790_v39  ;;  %v2414_v59 = vcombine.low %v228_v50, %v229_v51  ;;  %v1680_v24 = vld [vmem:[%s2253_s20 + $0x4c] sm:$0xf]  ;;  %v1677_v26 = vld [vmem:[%s2253_s20 + $0x3c] sm:$0xf] }
  0x40   : > { %1060 = vrot.lane.b32.xlu0 %v1038_v55, %s2154_s6  ;;  %v2408_v55 = vld [vmem:[%s2253_s20 + $0x38] ss:$0 sps:$4 sm:$0x11]   ;;  %v438_v58 = vshll.u32 %v2400_v47, 16  ;;  %v925_v60 = vshrl.u32 %v1785_v33, 16  ;;  %v929_v61 = vrot.slane %v927_v45, 1  ;;  %v1801_v0 = vcombine.low %v1729_v57, %v1708_v25 }
  0x41   : > { %v932_v62 = vshll.u32 %v2013_v46, 16  ;;  %v946_v3 = vrot.slane %v944_v54, 1  ;;  %v443_v4 = vshll.u32 %v2408_v55, 16  ;;  %v436_v5 = vshrl.u32 %v2400_v47, 16  ;;  %v246_v25 = vld [vmem:[%s2253_s20 + $0x30] sm:$0xe] }
  0x42   : > { %489 = vrot.lane.b32.xlu1 %v434_v2, %s2150_s28  ;;  %v942_v2 = vor.u32 %v941_v53, %v937_v52  ;;  %v450_v7 = vshll.u32 %v2414_v59, 16  ;;  %v930_v8 = vor.u32 %v929_v61, %v925_v60  ;;  %v1042_v13 = vrot.slane %v1801_v0, 1  ;;  %v1678_v27 = vld [vmem:[%s2253_s20 + $0x40] sm:$0xf]  ;;  %v1698_v52 = vld [vmem:[%s2253_s20 + $0x48] sm:$0xe] }
  0x43   : > { %v934_v9 = vrot.slane %v932_v62, 1  ;;  %v445_v12 = vrot.slane %v443_v4, 1  ;;  %v448_v18 = vshrl.u32 %v2414_v59, 16  ;;  %v1756_v31 = vcombine.low %v247_v21, %v229_v51  ;;  %v2451_v51 = vld [vmem:[%s2253_s20 + $0x44] ss:$0 sps:$4 sm:$0x11]  }
  0x44   : > { %1062 = vrot.lane.b32.xlu0 %v1041_v1, %s2154_s6  ;;  %v440_v1 = vrot.slane %v438_v58, 1  ;;  %v947_v11 = vsel %vm386_vm1, %v942_v2, %v946_v3  ;;  %v452_v19 = vrot.slane %v450_v7, 1  ;;  %v1046_v38 = vrot.slane %v2394_v43, 1  ;;  %v1713_v58 = vld [vmem:[%s2253_s20 + $0x54] sm:$0xf] }
  0x45   : > { %v935_v22 = vsel %vm386_vm1, %v930_v8, %v934_v9  ;;  %v1755_v39 = vcombine.low %v246_v25, %v2389_v37  ;;  %v539_v42 = vrot.slane %v1756_v31, 1  ;;  %v537_v37 = vrot.slane %v2408_v55, 1  ;;  %v1697_v60 = vld [vmem:[%s2253_s20 + $0x3c] sm:$0xe]  ;;  %v1711_v0 = vld [vmem:[%s2253_s20 + $0x48] sm:$0xf] }
  0x46   : > { %554 = vrot.lane.b32.xlu1 %v535_v14, %s2149_s25  ;;  %v1043_v14 = vrot.slane %v2013_v46, 1  ;;  %v441_v15 = vor.u32 %v440_v1, %v436_v5  ;;  %v2446_v46 = vld [vmem:[%s2253_s20 + $0x50] ss:$0 sps:$4 sm:$0x11]   ;;  %v2467_v2 = vld [vmem:[%s2253_s20 + $0x4c] sm:$0xf]  ;;  %v1780_v3 = vcombine.low %v1698_v52, %v1680_v24  ;;  %v1779_v5 = vcombine.low %v1697_v60, %v1678_v27 }
  0x47   : > { %v712_v57 = vshll.u32 %v2446_v46, 16  ;;  %v2475_v9 = vcombine.low %v1711_v0, %v2467_v2  ;;  %v793_v21 = vrot.slane %v2451_v51, 1 }
  0x48   : > { %552 = vrot.lane.b32.xlu0 %v532_v17, %s2149_s25  ;;  %v455_v17 = vshll.u32 %v2017_v6, 16  ;;  %v446_v32 = vsel %vm386_vm1, %v441_v15, %v445_v12  ;;  %v1044_v36 = vsel %vm523_vm0, %v1042_v13, %v1043_v14  ;;  %v2050_v12 = vld [vmem:[%s2841_s1 + $0x10] ss:$0 sps:$4 sm:$0x33]   ;;  %v795_v13 = vrot.slane %v1780_v3, 1 }
  0x49   : > { %v796_v14 = vrot.slane %v2446_v46, 1  ;;  %1896 = vmatprep.subr.msk.bf16.mxu0 %vm1249_vm2, %v2050_v12  ;;  %v1251_v31 = vsel %vm1249_vm2, %v2050_v12, 0  ;;  %1897 = vmatprep.subr.msk.bf16.mxu1 %vm1249_vm2, %v2050_v12  ;;  %v1731_v46 = vld [vmem:[%s2253_s20 + $0x48] sm:$0xe]  ;;  %v249_v3 = vld [vmem:[%s2253_s20 + $0x54] sm:$0xe] }
  0x4a   : > { %610 = vrot.lane.b32.xlu1 %v1762_v48, %s2147_s23  ;;  %v788_v48 = vsel %vm523_vm0, %v786_v40, %v787_v41  ;;  %v457_v34 = vrot.slane %v455_v17, 1  ;;  %v1763_v40 = vcombine.low %v1677_v26, %v1678_v27  ;;  %v792_v17 = vrot.slane %v1779_v5, 1  ;;  %v232_v27 = vld [vmem:[%s2253_s20 + $0x54] sm:$0xf]  ;;  %1869 = vmatpush3.bf16.msra.mxu0 %v1251_v31 }
  0x4b   : > { %v951_v26 = vshll.u32 %v2475_v9, 16  ;;  %1893 = vmatpush3.bf16.msra.mxu1 %v1251_v31  ;;  %v2042_v31 = vld [vmem:[%s2253_s20 + $0x68] ss:$0 sps:$4 sm:$0x11]  }
  0x4c   : > { %608 = vrot.lane.b32.xlu0 %v1761_v63, %s2147_s23  ;;  %v1730_v63 = vld [vmem:[%s2253_s20 + $0x3c] sm:$0xe]  ;;  %v695_v50 = vshll.u32 %v1763_v40, 16  ;;  %v693_v61 = vshrl.u32 %v1763_v40, 16 }
  0x4d   : > { %v1802_v10 = vcombine.low %v1730_v63, %v2379_v20  ;;  %v1679_v20 = vld [vmem:[%s2253_s20 + $0x48] sm:$0xf]  ;;  %v700_v63 = vshll.u32 %v2451_v51, 16 }
  0x4e   : > { %746 = vrot.lane.b32.xlu1 %v691_v44, %s2151_s29  ;;  %v1764_v35 = vcombine.low %v1679_v20, %v1680_v24  ;;  %v540_v44 = vrot.slane %v2017_v6, 1  ;;  %v697_v62 = vrot.slane %v695_v50, 1  ;;  %v714_v6 = vrot.slane %v712_v57, 1  ;;  %v2051_v24 = vld [vmem:[%s2841_s1 + $0x8] sm:$0xff]  }
  0x4f   : > { %v702_v8 = vrot.slane %v700_v63, 1  ;;  %1870 = vmatprep.subr.bf16.mxu0 %v2051_v24  ;;  %1891 = vmatprep.subr.bf16.mxu1 %v2051_v24 }
  0x50   : > { %744 = vrot.lane.b32.xlu0 %v679_v49, %s2151_s29  ;;  %v707_v45 = vshll.u32 %v1764_v35, 16  ;;  %v536_v49 = vrot.slane %v1755_v39, 1  ;;  %v705_v53 = vshrl.u32 %v1764_v35, 16  ;;  %v541_v54 = vsel %vm523_vm0, %v539_v42, %v540_v44  ;;  %1871 = vmatpush3.bf16.msra.mxu0 %v2051_v24 }
  0x51   : > { %v698_v7 = vor.u32 %v697_v62, %v693_v61  ;;  %v949_v42 = vshrl.u32 %v2475_v9, 16  ;;  %v953_v44 = vrot.slane %v951_v26, 1  ;;  %1894 = vmatpush3.bf16.msra.mxu1 %v2051_v24 }
  0x52   : > { %810 = vrot.lane.b32.xlu1 %v791_v56, %s2148_s24  ;;  %v709_v56 = vrot.slane %v707_v45, 1  ;;  %v538_v55 = vsel %vm523_vm0, %v536_v49, %v537_v37 }
  0x53   : > { %v703_v25 = vsel %vm386_vm1, %v698_v7, %v702_v8  ;;  %v954_v57 = vor.u32 %v953_v44, %v949_v42  ;;  %v248_v7 = vld [vmem:[%s2253_s20 + $0x48] sm:$0xe]  ;;  %v1681_v8 = vld [vmem:[%s2253_s20 + $0x54] sm:$0xf]  ;;  %v736_v42 = vshll.u32 %v2042_v31, 16 }
  0x54   : > { %808 = vrot.lane.b32.xlu0 %v788_v48, %s2148_s24  ;;  %v2460_v48 = vld [vmem:[%s2253_s20 + $0x58] sm:$0xf]  ;;  %v710_v1 = vor.u32 %v709_v56, %v705_v53  ;;  %v2035_v53 = vld [vmem:[%s2253_s20 + $0x5c] ss:$0 sps:$4 sm:$0x11]   ;;  %v1803_v56 = vcombine.low %v1731_v46, %v2467_v2 }
  0x55   : > { %v2471_v4 = vcombine.low %v1713_v58, %v2460_v48  ;;  %v479_v2 = vshll.u32 %v2035_v53, 16  ;;  %v546_v26 = vrot.slane %v2035_v53, 1 }
  0x56   : > { %866 = vrot.lane.b32.xlu1 %v1786_v28, %s2152_s30  ;;  %v1045_v28 = vrot.slane %v1802_v10, 1  ;;  %v230_v10 = vld [vmem:[%s2253_s20 + $0x48] sm:$0xf]  ;;  %v1048_v5 = vrot.slane %v1803_v56, 1 }
  0x57   : > { %v963_v15 = vshll.u32 %v2471_v4, 16 }
  0x58   : > { %864 = vrot.lane.b32.xlu0 %v1785_v33, %s2152_s30  ;;  %v453_v33 = vor.u32 %v452_v19, %v448_v18  ;;  %v1047_v43 = vsel %vm523_vm0, %v1045_v28, %v1046_v38  ;;  %v2488_v18 = vld [vmem:[%s2253_s20 + $0x5c] ss:$0 sps:$4 sm:$0x11]   ;;  %v715_v19 = vsel %vm386_vm1, %v710_v1, %v714_v6  ;;  %v2506_v28 = vld [vmem:[%s2253_s20 + $0x58] sm:$0xf] }
  0x59   : > { %v2518_v39 = vcombine.low %v232_v27, %v2506_v28  ;;  %v1683_v1 = vld [vmem:[%s2253_s20 + $0x60] sm:$0xf]  ;;  %v1684_v6 = vld [vmem:[%s2253_s20 + $0x64] sm:$0xf]  ;;  %v1758_v12 = vcombine.low %v249_v3, %v2506_v28 }
  0x5a   : > { %1002 = vrot.lane.b32.xlu1 %v947_v11, %s2153_s4  ;;  %v458_v41 = vsel %vm386_vm1, %v453_v33, %v457_v34  ;;  %v2479_v11 = vld [vmem:[%s2253_s20 + $0x4c] sm:$0xf]  ;;  %v965_v33 = vrot.slane %v963_v15, 1  ;;  %v968_v34 = vshll.u32 %v2488_v18, 16  ;;  %v481_v15 = vrot.slane %v479_v2, 1 }
  0x5b   : > { %v2497_v20 = vcombine.low %v230_v10, %v2479_v11  ;;  %v472_v63 = vshrl.u32 %v2518_v39, 16  ;;  %v1682_v10 = vld [vmem:[%s2253_s20 + $0x58] sm:$0xf]  ;;  %v2048_v2 = vld [vmem:[%s2253_s20 + $0x74] ss:$0 sps:$4 sm:$0x11]  }
  0x5c   : > { %1000 = vrot.lane.b32.xlu0 %v935_v22, %s2153_s4  ;;  %v2494_v22 = vld [vmem:[%s2253_s20 + $0x50] ss:$0 sps:$4 sm:$0x11]   ;;  %v970_v37 = vrot.slane %v968_v34, 1  ;;  %v1765_v24 = vcombine.low %v1681_v8, %v1682_v10 }
  0x5d   : > { %v462_v38 = vshll.u32 %v2497_v20, 16  ;;  %v956_v45 = vshll.u32 %v2494_v22, 16  ;;  %v460_v51 = vshrl.u32 %v2497_v20, 16  ;;  %v2043_v34 = vld [vmem:[%s2253_s20 + $0x5c] ss:$0 sps:$4 sm:$0x11]  }
  0x5e   : > { %491 = vrot.lane.b32.xlu1 %v446_v32, %s2150_s28  ;;  %v961_v32 = vshrl.u32 %v2471_v4, 16  ;;  %v717_v44 = vshrl.u32 %v1765_v24, 16 }
  0x5f   : > { %v464_v52 = vrot.slane %v462_v38, 1  ;;  %v958_v58 = vrot.slane %v956_v45, 1  ;;  %v1700_v38 = vld [vmem:[%s2253_s20 + $0x60] sm:$0xe] }
  0x60   : > { %1064 = vrot.lane.b32.xlu0 %v1044_v36, %s2154_s6  ;;  %v797_v36 = vsel %vm523_vm0, %v795_v13, %v796_v14  ;;  %v966_v49 = vor.u32 %v965_v33, %v961_v32 }
  0x61   : > { %v465_v62 = vor.u32 %v464_v52, %v460_v51  ;;  %v1716_v51 = vld [vmem:[%s2253_s20 + $0x64] sm:$0xf]  ;;  %v1782_v52 = vcombine.low %v1700_v38, %v1684_v6 }
  0x62   : > { %493 = vrot.lane.b32.xlu1 %v458_v41, %s2150_s28  ;;  %v794_v41 = vsel %vm523_vm0, %v792_v17, %v793_v21  ;;  %v971_v60 = vsel %vm386_vm1, %v966_v49, %v970_v37  ;;  %v1052_v21 = vrot.slane %v2488_v18, 1  ;;  %v1718_v49 = vld [vmem:[%s2253_s20 + $0x70] sm:$0xf]  ;;  %v1699_v37 = vld [vmem:[%s2253_s20 + $0x54] sm:$0xe] }
  0x64   : > { %1066 = vrot.lane.b32.xlu0 %v1047_v43, %s2154_s6  ;;  %v1732_v43 = vld [vmem:[%s2253_s20 + $0x54] sm:$0xe] }
  0x66   : > { %558 = vrot.lane.b32.xlu1 %v541_v54, %s2149_s25  ;;  %v474_v54 = vshll.u32 %v2518_v39, 16 }
  0x68   : > { %556 = vrot.lane.b32.xlu0 %v538_v55, %s2149_s25  ;;  %v1804_v55 = vcombine.low %v1732_v43, %v2460_v48  ;;  %v476_v0 = vrot.slane %v474_v54, 1  ;;  %v959_v48 = vsel %vm386_vm1, %v954_v57, %v958_v58  ;;  %v1717_v43 = vld [vmem:[%s2253_s20 + $0x6c] sm:$0xf]  ;;  %v738_v54 = vrot.slane %v736_v42, 1 }
  0x69   : > { %v1790_v56 = vcombine.low %v1717_v43, %v1718_v49  ;;  %v1781_v57 = vcombine.low %v1699_v37, %v1682_v10  ;;  %v992_v10 = vshll.u32 %v2048_v2, 16 }
  0x6a   : > { %614 = vrot.lane.b32.xlu1 %v1764_v35, %s2147_s23  ;;  %v2512_v35 = vld [vmem:[%s2253_s20 + $0x50] ss:$0 sps:$4 sm:$0x11]   ;;  %v477_v14 = vor.u32 %v476_v0, %v472_v63  ;;  %v802_v63 = vrot.slane %v2042_v31, 1 }
  0x6b   : > { %v467_v50 = vshll.u32 %v2512_v35, 16  ;;  %v543_v18 = vrot.slane %v2512_v35, 1  ;;  %v724_v35 = vshll.u32 %v2043_v34, 16  ;;  %v987_v0 = vshll.u32 %v1790_v56, 16 }
  0x6c   : > { %612 = vrot.lane.b32.xlu0 %v1763_v40, %s2147_s23  ;;  %v2052_v40 = vld [vmem:[%s2841_s1] sm:$0xff]   ;;  %v482_v27 = vsel %vm386_vm1, %v477_v14, %v481_v15 }
  0x6d   : > { %1872 = vmatprep.subr.bf16.mxu0 %v2052_v40  ;;  %1892 = vmatprep.subr.bf16.mxu1 %v2052_v40  ;;  %v469_v61 = vrot.slane %v467_v50, 1  ;;  %v1715_v50 = vld [vmem:[%s2253_s20 + $0x60] sm:$0xf]  ;;  %v989_v8 = vrot.slane %v987_v0, 1 }
  0x6e   : > { %750 = vrot.lane.b32.xlu1 %v715_v19, %s2151_s29  ;;  %1873 = vmatpush3.bf16.msra.mxu0 %v2052_v40  ;;  %v1766_v19 = vcombine.low %v1683_v1, %v1684_v6  ;;  %v2049_v1 = vld [vmem:[%s2253_s20 + $0x68] ss:$0 sps:$4 sm:$0x11]  }
  0x6f   : > { %1895 = vmatpush3.bf16.msra.mxu1 %v2052_v40  ;;  %v470_v13 = vsel %vm386_vm1, %v465_v62, %v469_v61  ;;  %v801_v62 = vrot.slane %v1782_v52, 1  ;;  %v980_v15 = vshll.u32 %v2049_v1, 16  ;;  %v1055_v38 = vrot.slane %v2049_v1, 1 }
  0x70   : > { %748 = vrot.lane.b32.xlu0 %v703_v25, %s2151_s29  ;;  %v545_v25 = vrot.slane %v1758_v12, 1  ;;  %v731_v28 = vshll.u32 %v1766_v19, 16  ;;  %v729_v40 = vshrl.u32 %v1766_v19, 16  ;;  %v1734_v12 = vld [vmem:[%s2253_s20 + $0x6c] sm:$0xe] }
  0x71   : > { %v803_v6 = vsel %vm523_vm0, %v801_v62, %v802_v63 }
  0x72   : > { %814 = vrot.lane.b32.xlu1 %v797_v36, %s2148_s24  ;;  %v547_v36 = vsel %vm523_vm0, %v545_v25, %v546_v26  ;;  %v994_v25 = vrot.slane %v992_v10, 1 }
  0x74   : > { %812 = vrot.lane.b32.xlu0 %v794_v41, %s2148_s24  ;;  %v733_v41 = vrot.slane %v731_v28, 1  ;;  %v982_v28 = vrot.slane %v980_v15, 1 }
  0x76   : > { %870 = vrot.lane.b32.xlu1 %v2471_v4, %s2152_s30  ;;  %v1049_v4 = vrot.slane %v2494_v22, 1  ;;  %v1757_v22 = vcombine.low %v248_v7, %v2479_v11  ;;  %v719_v11 = vshll.u32 %v1765_v24, 16  ;;  %v734_v53 = vor.u32 %v733_v41, %v729_v40 }
  0x77   : > { %v985_v7 = vshrl.u32 %v1790_v56, 16 }
  0x78   : > { %868 = vrot.lane.b32.xlu0 %v2475_v9, %s2152_s30  ;;  %v1051_v9 = vrot.slane %v1804_v55, 1  ;;  %v1050_v17 = vsel %vm523_vm0, %v1048_v5, %v1049_v4  ;;  %v542_v33 = vrot.slane %v1757_v22, 1  ;;  %v721_v46 = vrot.slane %v719_v11, 1 }
  0x79   : > { %v726_v55 = vrot.slane %v724_v35, 1  ;;  %v739_v61 = vsel %vm386_vm1, %v734_v53, %v738_v54  ;;  %v799_v5 = vrot.slane %v2043_v34, 1  ;;  %v1806_v22 = vcombine.low %v1734_v12, %v1718_v49 }
  0x7a   : > { %1006 = vrot.lane.b32.xlu1 %v971_v60, %s2153_s4  ;;  %v1053_v32 = vsel %vm523_vm0, %v1051_v9, %v1052_v21  ;;  %v544_v45 = vsel %vm523_vm0, %v542_v33, %v543_v18  ;;  %v722_v58 = vor.u32 %v721_v46, %v717_v44  ;;  %v1789_v60 = vcombine.low %v1715_v50, %v1716_v51 }
  0x7b   : > { %v1057_v33 = vrot.slane %v1806_v22, 1  ;;  %v1058_v18 = vrot.slane %v2048_v2, 1 }
  0x7c   : > { %1004 = vrot.lane.b32.xlu0 %v959_v48, %s2153_s4  ;;  %v727_v3 = vsel %vm386_vm1, %v722_v58, %v726_v55  ;;  %v798_v48 = vrot.slane %v1781_v57, 1  ;;  %v975_v4 = vshll.u32 %v1789_v60, 16 }
  0x7d   : > { %v1059_v40 = vsel %vm523_vm0, %v1057_v33, %v1058_v18 }
  0x7e   : > { %495 = vrot.lane.b32.xlu1 %v470_v13, %s2150_s28  ;;  %v800_v9 = vsel %vm523_vm0, %v798_v48, %v799_v5  ;;  %v973_v13 = vshrl.u32 %v1789_v60, 16  ;;  %v977_v14 = vrot.slane %v975_v4, 1 }
  0x80   : > { %1068 = vrot.lane.b32.xlu0 %v1050_v17, %s2154_s6 }
  0x82   : > { %497 = vrot.lane.b32.xlu1 %v482_v27, %s2150_s28  ;;  %v978_v27 = vor.u32 %v977_v14, %v973_v13 }
  0x84   : > { %1070 = vrot.lane.b32.xlu0 %v1053_v32, %s2154_s6  ;;  %v983_v34 = vsel %vm386_vm1, %v978_v27, %v982_v28 }
  0x86   : > { %562 = vrot.lane.b32.xlu1 %v547_v36, %s2149_s25 }
  0x88   : > { %560 = vrot.lane.b32.xlu0 %v544_v45, %s2149_s25 }
  0x8a   : > { %618 = vrot.lane.b32.xlu1 %v1766_v19, %s2147_s23  ;;  %v1733_v19 = vld [vmem:[%s2253_s20 + $0x60] sm:$0xe]  ;;  %s1660_s20 = sshll.u32 %s2133_s16, 1 }
  0x8b   : > { %v1805_v26 = vcombine.low %v1733_v19, %v1716_v51 }
  0x8c   : > { %616 = vrot.lane.b32.xlu0 %v1765_v24, %s2147_s23  ;;  %v990_v24 = vor.u32 %v989_v8, %v985_v7  ;;  %s2682_s23 = sadd.s32 %s2129_s15, %s1660_s20  ;;  %s192_s15 = sand.u32 1, %s2121_s13  }
  0x8d   : > { %v1054_v36 = vrot.slane %v1805_v26, 1  ;;  %s1658_s16 = sshll.u32 %s192_s15, 1  ;;  %s1518_s7 = scalar_lea.sflag [#allocation3], %s192_s15 }
  0x8e   : > { %754 = vrot.lane.b32.xlu1 %v739_v61, %s2151_s29  ;;  %v995_v32 = vsel %vm386_vm1, %v990_v24, %v994_v25 }
  0x8f   : > { %v1056_v42 = vsel %vm523_vm0, %v1054_v36, %v1055_v38 }
  0x90   : > { %752 = vrot.lane.b32.xlu0 %v727_v3, %s2151_s29 }
  0x92   : > { %818 = vrot.lane.b32.xlu1 %v803_v6, %s2148_s24  ;;  %v607_v17 = vpop.permute.xlu1 %606 }
  0x93   : > { %v605_v21 = vpop.permute.xlu0 %604 }
  0x94   : > { %816 = vrot.lane.b32.xlu0 %v800_v9, %s2148_s24  ;;  %s1661_s24 = sshll.u32 %s2682_s23, 3 }
  0x95   : > { %p203_p13 = scmp.lt.s32.totalorder %s1661_s24, 31 }
  0x96   : > { %874 = vrot.lane.b32.xlu1 %v1790_v56, %s2152_s30 }
  0x97   : > { %v805_v31 = vpop.permute.xlu0 %804  ;;  %s2860_s24 = smov (!%p203_p13, %s1661_s24), 31 }
  0x98   : > { %872 = vrot.lane.b32.xlu0 %v1789_v60, %s2152_s30  ;;  %v549_v11 = vpop.permute.xlu1 %548  ;;  %s1839_s25 = sshll.u32 %s2860_s24, 3 }
  0x99   : > { %s2690_s30 = scalar_lea.vmem %s2842_s2, %s1839_s25 }
  0x9a   : > { %1010 = vrot.lane.b32.xlu1 %v995_v32, %s2153_s4 }
  0x9c   : > { %1008 = vrot.lane.b32.xlu0 %v983_v34, %s2153_s4  ;;  %v551_v41 = vpop.permute.xlu1 %550  ;;  %s1836_s4 = sshll.u32 %s2682_s23, 5  ;;  %s2155_s23 = smov [#allocation2]  }
  0x9d   : > { %s2793_s11 = scalar_lea.hbm %s2843_s3, %s1836_s4  ;;  %s2057_s24 = sshll.u32 %s2155_s23, 4  ;;  %s2058_s24 = int_to_ptr.vmem [resolvable:$false] %s2057_s24 }
  0x9e   : > { %v484_v44 = vpop.permute.xlu0 %483  ;;  %1074 = vrot.lane.b32.xlu1 %v1059_v40, %s2154_s6  ;;  %s2059_s25 = scalar_lea.vmem %s2058_s24, 64 }
  0x9f   : > { %v1078_v43 = vsel %vm1076_vm3, %v2281_v23, %v484_v44 }
  0xa0   : > { %1072 = vrot.lane.b32.xlu0 %v1056_v42, %s2154_s6  ;;  %v807_v45 = vpop.permute.xlu1 %806  ;;  %v1095_v50 = vsel %vm1093_vm4, %v1078_v43, %v549_v11  ;;  %s194_s6 = scalar_lea.vmem [#allocation2], %s1658_s16 }
  0xa1   : > { %v1112_v54 = vsel %vm1110_vm5, %v1095_v50, %v605_v21  ;;  %s1539_s8 = sshll.u32 %s194_s6, 4  ;;  %s1540_s8 = int_to_ptr.vmem [resolvable:$true] %s1539_s8 }
  0xa2   : > { %v486_v46 = vpop.permute.xlu0 %485  ;;  %s2053_s20 = scalar_lea.vmem %s1540_s8, 32  ;;  %p2060_p3 = scmp.lt.s32.totalorder %s1540_s8, %s2058_s24 }
  0xa3   : > { %v1080_v37 = vsel %vm1076_vm3, %v2286_v29, %v486_v46  ;;  %p2054_p0 = scmp.ne.s32.totalorder %s1540_s8, %s2053_s20  ;;  %p2061_p4 = scmp.lt.s32.totalorder %s2059_s25, %s2053_s20 }
  0xa4   : > { %v743_v35 = vpop.permute.xlu1 %742  ;;  %v1097_v53 = vsel %vm1093_vm4, %v1080_v37, %v551_v41 }
  0xa5   : > { %v1114_v23 = vsel %vm1110_vm5, %v1097_v53, %v607_v17  ;;  %p2055_p1 = pnand %p2054_p0, %p2229_p5  ;;  %p2062_p6 = por %p2061_p4, %p2060_p3 }
  0xa6   : > { %v741_v49 = vpop.permute.xlu0 %740  ;;  %v1131_v55 = vsel %vm1127_vm6, %v1114_v23, %v743_v35 }
  0xa7   : > { %v1129_v56 = vsel %vm1127_vm6, %v1112_v54, %v741_v49  ;;  %v1148_v2 = vsel %vm1144_vm7, %v1131_v55, %v807_v45  ;;  %p2056_p2 = pneg %p2055_p1 }
  0xa8   : > { %v863_v51 = vpop.permute.xlu1 %862  ;;  %v1146_v29 = vsel %vm1144_vm7, %v1129_v56, %v805_v31 }
  0xa9   : > { %v1165_v3 = vsel %vm1161_vm8, %v1148_v2, %v863_v51  ;;  %p2063_p8 = pnand %p2062_p6, %p2056_p2 }
  0xaa   : > { %v861_v52 = vpop.permute.xlu0 %860 }
  0xab   : > { %v1163_v60 = vsel %vm1161_vm8, %v1146_v29, %v861_v52 }
  0xac   : > { %v999_v57 = vpop.permute.xlu1 %998 }
  0xad   : > { %v1182_v5 = vsel %vm1178_vm9, %v1165_v3, %v999_v57 }
  0xae   : > { %v997_v58 = vpop.permute.xlu0 %996 }
  0xaf   : > { %v1180_v62 = vsel %vm1178_vm9, %v1163_v60, %v997_v58 }
  0xb0   : > { %v488_v61 = vpop.permute.xlu1 %487 }
  0xb1   : > { %v1082_v17 = vsel %vm1076_vm3, %v2326_v16, %v488_v61 }
  0xb2   : > { %v1061_v63 = vpop.permute.xlu0 %1060 }
  0xb3   : > { %v1197_v0 = vsel %vm1195_vm10, %v1180_v62, %v1061_v63 }
  0xb4   : > { %1874 = vmatprep.mubr.msk.bf16.mxu0 %vm1232_vm11, %v1197_v0  ;;  %v490_v48 = vpop.permute.xlu1 %489 }
  0xb5   : > { %v1084_v27 = vsel %vm1076_vm3, %v2337_v30, %v490_v48 }
  0xb6   : > { %v1063_v4 = vpop.permute.xlu0 %1062 }
  0xb7   : > { %v1199_v1 = vsel %vm1195_vm10, %v1182_v5, %v1063_v4 }
  0xb8   : > { %1875 = vmatmul.mubr.msk.bf16.vlgmr.msra.gmra.mxu0 %vm1232_vm11, %v1199_v1  ;;  %v555_v6 = vpop.permute.xlu1 %554 }
  0xb9   : > { %v1101_v31 = vsel %vm1093_vm4, %v1084_v27, %v555_v6 }
  0xba   : > { %v553_v7 = vpop.permute.xlu0 %552 }
  0xbb   : > { %v1099_v21 = vsel %vm1093_vm4, %v1082_v17, %v553_v7 }
  0xbc   : > { %v611_v8 = vpop.permute.xlu1 %610 }
  0xbd   : > { %v1118_v16 = vsel %vm1110_vm5, %v1101_v31, %v611_v8 }
  0xbe   : > { %v609_v10 = vpop.permute.xlu0 %608 }
  0xbf   : > { %v1116_v24 = vsel %vm1110_vm5, %v1099_v21, %v609_v10 }
  0xc0   : > { %v747_v9 = vpop.permute.xlu1 %746 }
  0xc1   : > { %v1135_v34 = vsel %vm1127_vm6, %v1118_v16, %v747_v9 }
  0xc2   : > { %v745_v12 = vpop.permute.xlu0 %744 }
  0xc3   : > { %v1133_v26 = vsel %vm1127_vm6, %v1116_v24, %v745_v12 }
  0xc4   : > { %v811_v13 = vpop.permute.xlu1 %810 }
  0xc5   : > { %v1152_v38 = vsel %vm1144_vm7, %v1135_v34, %v811_v13 }
  0xc6   : > { %v809_v14 = vpop.permute.xlu0 %808 }
  0xc7   : > { %v1150_v28 = vsel %vm1144_vm7, %v1133_v26, %v809_v14 }
  0xc8   : > { %v867_v15 = vpop.permute.xlu1 %866 }
  0xc9   : > { %v1169_v30 = vsel %vm1161_vm8, %v1152_v38, %v867_v15 }
  0xca   : > { %v865_v19 = vpop.permute.xlu0 %864 }
  0xcb   : > { %v1167_v32 = vsel %vm1161_vm8, %v1150_v28, %v865_v19 }
  0xcc   : > { %v1003_v22 = vpop.permute.xlu1 %1002 }
  0xcd   : > { %v1186_v41 = vsel %vm1178_vm9, %v1169_v30, %v1003_v22 }
  0xce   : > { %v1001_v25 = vpop.permute.xlu0 %1000 }
  0xcf   : > { %v1184_v18 = vsel %vm1178_vm9, %v1167_v32, %v1001_v25 }
  0xd0   : > { %v492_v33 = vpop.permute.xlu1 %491 }
  0xd1   : > { %v1086_v54 = vsel %vm1076_vm3, %v2400_v47, %v492_v33 }
  0xd2   : > { %v1065_v11 = vpop.permute.xlu0 %1064 }
  0xd3   : > { %v1201_v36 = vsel %vm1195_vm10, %v1184_v18, %v1065_v11 }
  0xd4   : > { %1878 = vmatprep.mubr.msk.bf16.mxu0 %vm1232_vm11, %v1201_v36  ;;  %v494_v40 = vpop.permute.xlu1 %493 }
  0xd5   : > { %v1088_v55 = vsel %vm1076_vm3, %v2414_v59, %v494_v40 }
  0xd6   : > { %v1067_v42 = vpop.permute.xlu0 %1066 }
  0xd7   : > { %v1203_v44 = vsel %vm1195_vm10, %v1186_v41, %v1067_v42 }
  0xd8   : > { %1879 = vmatmul.mubr.msk.bf16.gmra.mxu0 %vm1232_vm11, %v1203_v44  ;;  %v559_v45 = vpop.permute.xlu1 %558 }
  0xd9   : > { %v1105_v61 = vsel %vm1093_vm4, %v1088_v55, %v559_v45 }
  0xda   : > { %v557_v46 = vpop.permute.xlu0 %556 }
  0xdb   : > { %v1103_v56 = vsel %vm1093_vm4, %v1086_v54, %v557_v46 }
  0xdc   : > { %v615_v35 = vpop.permute.xlu1 %614 }
  0xdd   : > { %v1122_v47 = vsel %vm1110_vm5, %v1105_v61, %v615_v35 }
  0xde   : > { %v613_v43 = vpop.permute.xlu0 %612 }
  0xdf   : > { %v1120_v23 = vsel %vm1110_vm5, %v1103_v56, %v613_v43 }
  0xe0   : > { %v751_v49 = vpop.permute.xlu1 %750 }
  0xe1   : > { %v1139_v3 = vsel %vm1127_vm6, %v1122_v47, %v751_v49 }
  0xe2   : > { %v749_v37 = vpop.permute.xlu0 %748 }
  0xe3   : > { %v1137_v29 = vsel %vm1127_vm6, %v1120_v23, %v749_v37 }
  0xe4   : > { %v815_v50 = vpop.permute.xlu1 %814 }
  0xe5   : > { %v1156_v5 = vsel %vm1144_vm7, %v1139_v3, %v815_v50 }
  0xe6   : > { %v813_v51 = vpop.permute.xlu0 %812 }
  0xe7   : > { %v1154_v60 = vsel %vm1144_vm7, %v1137_v29, %v813_v51 }
  0xe8   : > { %v871_v52 = vpop.permute.xlu1 %870 }
  0xe9   : > { %v1173_v59 = vsel %vm1161_vm8, %v1156_v5, %v871_v52 }
  0xea   : > { %v869_v53 = vpop.permute.xlu0 %868 }
  0xeb   : > { %v1171_v62 = vsel %vm1161_vm8, %v1154_v60, %v869_v53 }
  0xec   : > { %v1007_v57 = vpop.permute.xlu1 %1006 }
  0xed   : > { %v1190_v1 = vsel %vm1178_vm9, %v1173_v59, %v1007_v57 }
  0xee   : > { %v1005_v58 = vpop.permute.xlu0 %1004 }
  0xef   : > { %v1188_v0 = vsel %vm1178_vm9, %v1171_v62, %v1005_v58 }
  0xf0   : > { %v496_v63 = vpop.permute.xlu1 %495 }
  0xf1   : > { %v1090_v24 = vsel %vm1076_vm3, %v2497_v20, %v496_v63 }
  0xf2   : > { %v1069_v2 = vpop.permute.xlu0 %1068 }
  0xf3   : > { %v1205_v48 = vsel %vm1195_vm10, %v1188_v0, %v1069_v2 }
  0xf4   : > { %1882 = vmatprep.mubr.msk.bf16.mxu1 %vm1232_vm11, %v1205_v48  ;;  %v498_v4 = vpop.permute.xlu1 %497 }
  0xf5   : > { %v1092_v22 = vsel %vm1076_vm3, %v2518_v39, %v498_v4 }
  0xf6   : > { %v1071_v6 = vpop.permute.xlu0 %1070 }
  0xf7   : > { %v1207_v7 = vsel %vm1195_vm10, %v1190_v1, %v1071_v6 }
  0xf8   : > { %1883 = vmatmul.mubr.msk.bf16.vlgmr.msra.gmra.mxu1 %vm1232_vm11, %v1207_v7  ;;  %v563_v8 = vpop.permute.xlu1 %562 }
  0xf9   : > { %v1109_v25 = vsel %vm1093_vm4, %v1092_v22, %v563_v8 }
  0xfa   : > { %v561_v10 = vpop.permute.xlu0 %560 }
  0xfb   : > { %v1107_v26 = vsel %vm1093_vm4, %v1090_v24, %v561_v10 }
  0xfc   : > { %v619_v9 = vpop.permute.xlu1 %618 }
  0xfd   : > { %v1126_v27 = vsel %vm1110_vm5, %v1109_v25, %v619_v9 }
  0xfe   : > { %v617_v12 = vpop.permute.xlu0 %616 }
  0xff   : > { %v1124_v31 = vsel %vm1110_vm5, %v1107_v26, %v617_v12 }
 0x100   : > { %v755_v13 = vpop.permute.xlu1 %754 }
 0x101   : > { %v1143_v32 = vsel %vm1127_vm6, %v1126_v27, %v755_v13 }
 0x102   : > { %v753_v14 = vpop.permute.xlu0 %752 }
 0x103   : > { %v1141_v16 = vsel %vm1127_vm6, %v1124_v31, %v753_v14 }
 0x104   : > { %v819_v15 = vpop.permute.xlu1 %818 }
 0x105   : > { %v1160_v39 = vsel %vm1144_vm7, %v1143_v32, %v819_v15 }
 0x106   : > { %v817_v19 = vpop.permute.xlu0 %816 }
 0x107   : > { %v1158_v20 = vsel %vm1144_vm7, %v1141_v16, %v817_v19 }
 0x108   : > { %v875_v17 = vpop.permute.xlu1 %874 }
 0x109   : > { %v1177_v18 = vsel %vm1161_vm8, %v1160_v39, %v875_v17 }
 0x10a   : > { %v873_v21 = vpop.permute.xlu0 %872 }
 0x10b   : > { %v1175_v11 = vsel %vm1161_vm8, %v1158_v20, %v873_v21 }
 0x10c   : > { %v1011_v28 = vpop.permute.xlu1 %1010 }
 0x10d   : > { %v1194_v34 = vsel %vm1178_vm9, %v1177_v18, %v1011_v28 }
 0x10e   : > { %v1009_v33 = vpop.permute.xlu0 %1008 }
 0x10f   : > { %v1192_v38 = vsel %vm1178_vm9, %v1175_v11, %v1009_v33 }
 0x110   : > { %v1075_v36 = vpop.permute.xlu1 %1074 }
 0x111   : > { %v1211_v30 = vsel %vm1195_vm10, %v1194_v34, %v1075_v36 }
 0x112   : > { %v1073_v40 = vpop.permute.xlu0 %1072 }
 0x113   : > { %v1209_v41 = vsel %vm1195_vm10, %v1192_v38, %v1073_v40 }
 0x114   : > { %1886 = vmatprep.mubr.msk.bf16.mxu1 %vm1232_vm11, %v1209_v41 }
 0x115   : > { %1887 = vmatmul.mubr.msk.bf16.gmra.mxu1 %vm1232_vm11, %v1211_v30 }
 0x178   : > { %v2685_v42 = vpop.f32.mrf.mxu0 }
 0x179   : > { %v1843_v44 = vpack.c.bf16 %v2685_v42, %v2685_v42 }
 0x17a   : > { %v2694_v45 = vpop.f32.mrf.mxu0 }
 0x17b   : > { %v1841_v46 = vpack.c.bf16 %v2694_v45, %v2694_v45  ;;  %1417 = vst.msk [vmem:[%s2690_s30 + $0x8] sm:$0xf] %vm1414_vm12, %v1843_v44 }
 0x17c   : > { %v2700_v35 = vpop.f32.mrf.mxu0 }
 0x17d   : > { %v1844_v43 = vpack.c.bf16 %v2700_v35, %v2700_v35  ;;  %1415 = vst.msk [vmem:[%s2690_s30] sm:$0xf] %vm1414_vm12, %v1841_v46 }
 0x17e   : > { %v2706_v49 = vpop.f32.mrf.mxu0 }
 0x17f   : > { %v1842_v37 = vpack.c.bf16 %v2706_v49, %v2706_v49  ;;  %1418 = vst.msk [vmem:[%s2690_s30 + $0xc] sm:$0xf] %vm1414_vm12, %v1844_v43  ;;  %v1431_v58 = vadd.f32 %v2706_v49, %v2694_v45 }
 0x181   : > { %1416 = vst.msk [vmem:[%s2690_s30 + $0x4] sm:$0xf] %vm1414_vm12, %v1842_v37  ;;  %v1432_v62 = vadd.f32 %v2685_v42, %v1431_v58 }
 0x183   : > { %v1433_v3 = vadd.f32 %v2700_v35, %v1432_v62 }
 0x198   : > { %v2714_v50 = vpop.f32.mrf.mxu0 }
 0x199   : > { %v1847_v51 = vpack.c.bf16 %v2714_v50, %v2714_v50 }
 0x19a   : > { %v1303_v52 = vpop.f32.mrf.mxu0 }
 0x19b   : > { %v1845_v53 = vpack.c.bf16 %v1303_v52, %v1303_v52  ;;  %1421 = vst.msk [vmem:[%s2690_s30 + $0x18] sm:$0xf] %vm1414_vm12, %v1847_v51  ;;  %v1434_v48 = vadd.f32 %v1433_v3, %v1303_v52 }
 0x19c   : > { %v2720_v54 = vpop.f32.mrf.mxu0 }
 0x19d   : > { %v1848_v56 = vpack.c.bf16 %v2720_v54, %v2720_v54  ;;  %1419 = vst.msk [vmem:[%s2690_s30 + $0x10] sm:$0xf] %vm1414_vm12, %v1845_v53 }
 0x19e   : > { %v1306_v57 = vpop.f32.mrf.mxu0 }
 0x19f   : > { %v1846_v23 = vpack.c.bf16 %v1306_v57, %v1306_v57  ;;  %1422 = vst.msk [vmem:[%s2690_s30 + $0x1c] sm:$0xf] %vm1414_vm12, %v1848_v56  ;;  %v1435_v5 = vadd.f32 %v1434_v48, %v1306_v57 }
 0x1a1   : > { %1420 = vst.msk [vmem:[%s2690_s30 + $0x14] sm:$0xf] %vm1414_vm12, %v1846_v23  ;;  %v1436_v59 = vadd.f32 %v2714_v50, %v1435_v5 }
 0x1a3   : > { %v1437_v4 = vadd.f32 %v2720_v54, %v1436_v59 }
 0x1b8   : > { %v2732_v29 = vpop.f32.mrf.mxu1 }
 0x1b9   : > { %v1851_v55 = vpack.c.bf16 %v2732_v29, %v2732_v29 }
 0x1ba   : > { %v1319_v60 = vpop.f32.mrf.mxu1 }
 0x1bb   : > { %v1849_v61 = vpack.c.bf16 %v1319_v60, %v1319_v60  ;;  %1425 = vst.msk [vmem:[%s2690_s30 + $0x28] sm:$0xf] %vm1414_vm12, %v1851_v55  ;;  %v1438_v1 = vadd.f32 %v1437_v4, %v1319_v60 }
 0x1bc   : > { %v2739_v63 = vpop.f32.mrf.mxu1 }
 0x1bd   : > { %v1852_v47 = vpack.c.bf16 %v2739_v63, %v2739_v63  ;;  %1423 = vst.msk [vmem:[%s2690_s30 + $0x20] sm:$0xf] %vm1414_vm12, %v1849_v61 }
 0x1be   : > { %v1322_v0 = vpop.f32.mrf.mxu1 }
 0x1bf   : > { %v1850_v2 = vpack.c.bf16 %v1322_v0, %v1322_v0  ;;  %1426 = vst.msk [vmem:[%s2690_s30 + $0x2c] sm:$0xf] %vm1414_vm12, %v1852_v47  ;;  %v1439_v6 = vadd.f32 %v1438_v1, %v1322_v0 }
 0x1c1   : > { %1424 = vst.msk [vmem:[%s2690_s30 + $0x24] sm:$0xf] %vm1414_vm12, %v1850_v2  ;;  %v1440_v7 = vadd.f32 %v2732_v29, %v1439_v6 }
 0x1c3   : > { %v1441_v13 = vadd.f32 %v2739_v63, %v1440_v7 }
 0x1d5   : > { %v1888_v8 = vpop.f32.mrf.mxu1 }
 0x1d6   : > { %v1855_v10 = vpack.c.bf16 %v1888_v8, %v1888_v8 }
 0x1d7   : > { %v1335_v9 = vpop.f32.mrf.mxu1 }
 0x1d8   : > { %v1853_v12 = vpack.c.bf16 %v1335_v9, %v1335_v9  ;;  %1429 = vst.msk [vmem:[%s2690_s30 + $0x38] sm:$0xf] %vm1414_vm12, %v1855_v10  ;;  %v1442_v15 = vadd.f32 %v1441_v13, %v1335_v9 }
 0x1d9   : > { %v1889_v14 = vpop.f32.mrf.mxu1 }
 0x1da   : > { %v1856_v19 = vpack.c.bf16 %v1889_v14, %v1889_v14  ;;  %1427 = vst.msk [vmem:[%s2690_s30 + $0x30] sm:$0xf] %vm1414_vm12, %v1853_v12 }
 0x1db   : > { %v1338_v17 = vpop.f32.mrf.mxu1 }
 0x1dc   : > { %v1854_v21 = vpack.c.bf16 %v1338_v17, %v1338_v17  ;;  %v1443_v22 = vadd.f32 %v1442_v15, %v1338_v17  ;;  %1430 = vst.msk [vmem:[%s2690_s30 + $0x3c] sm:$0xf] %vm1414_vm12, %v1856_v19 }
 0x1de   : > { %v1444_v24 = vadd.f32 %v1888_v8, %v1443_v22  ;;  %1428 = vst.msk [vmem:[%s2690_s30 + $0x34] sm:$0xf] %vm1414_vm12, %v1854_v21 }
 0x1e0   : > { %v1445_v25 = vadd.f32 %v1889_v14, %v1444_v24 }
 0x1e2   : > { %v1446_v26 = vrot.slane %v1445_v25, 4 }
 0x1e4   : > { %v1447_v27 = vadd.f32 %v1446_v26, %v1445_v25 }
 0x1e6   : > { %v1448_v28 = vrot.slane %v1447_v27, 2 }
 0x1e8   : > { %v1449_v31 = vadd.f32 %v1448_v28, %v1447_v27 }
 0x1ea   : > { %v1450_v32 = vrot.slane %v1449_v31, 1 }
 0x1ec   : > { %v1451_v33 = vadd.f32 %v1450_v32, %v1449_v31 }
 0x1ee   : > { %v2762_v16 = vmul.f32 0.0078125, %v1451_v33 }
 0x1f0   : > { %v1453_v39 = vsub.f32 %v2694_v45, %v2762_v16  ;;  %v1454_v20 = vsub.f32 %v2706_v49, %v2762_v16  ;;  %v1455_v18 = vsub.f32 %v2685_v42, %v2762_v16  ;;  %v1456_v36 = vsub.f32 %v2700_v35, %v2762_v16 }
 0x1f1   : > { %v1457_v38 = vsub.f32 %v1303_v52, %v2762_v16  ;;  %v1458_v41 = vsub.f32 %v1306_v57, %v2762_v16  ;;  %v1459_v45 = vsub.f32 %v2714_v50, %v2762_v16  ;;  %v1460_v42 = vsub.f32 %v2720_v54, %v2762_v16 }
 0x1f2   : > { %v1469_v11 = vmul.f32 %v1453_v39, %v1453_v39  ;;  %v1470_v34 = vmul.f32 %v1454_v20, %v1454_v20  ;;  %v1471_v30 = vmul.f32 %v1455_v18, %v1455_v18  ;;  %v1472_v44 = vmul.f32 %v1456_v36, %v1456_v36 }
 0x1f3   : > { %v1473_v43 = vmul.f32 %v1457_v38, %v1457_v38  ;;  %v1474_v37 = vmul.f32 %v1458_v41, %v1458_v41  ;;  %v1461_v35 = vsub.f32 %v1319_v60, %v2762_v16  ;;  %v1475_v53 = vmul.f32 %v1459_v45, %v1459_v45 }
 0x1f4   : > { %v1485_v40 = vadd.f32 %v1470_v34, %v1469_v11  ;;  %v1462_v56 = vsub.f32 %v1322_v0, %v2762_v16  ;;  %v1476_v23 = vmul.f32 %v1460_v42, %v1460_v42  ;;  %v1463_v58 = vsub.f32 %v2732_v29, %v2762_v16 }
 0x1f5   : > { %v1477_v55 = vmul.f32 %v1461_v35, %v1461_v35  ;;  %v1464_v61 = vsub.f32 %v2739_v63, %v2762_v16  ;;  %v1465_v47 = vsub.f32 %v1335_v9, %v2762_v16  ;;  %v1466_v3 = vsub.f32 %v1338_v17, %v2762_v16 }
 0x1f6   : > { %v1486_v46 = vadd.f32 %v1485_v40, %v1471_v30  ;;  %v1478_v62 = vmul.f32 %v1462_v56, %v1462_v56  ;;  %v1479_v2 = vmul.f32 %v1463_v58, %v1463_v58  ;;  %v1467_v5 = vsub.f32 %v1888_v8, %v2762_v16 }
 0x1f7   : > { %v1480_v0 = vmul.f32 %v1464_v61, %v1464_v61  ;;  %v1481_v59 = vmul.f32 %v1465_v47, %v1465_v47  ;;  %v1468_v4 = vsub.f32 %v1889_v14, %v2762_v16  ;;  %v1482_v1 = vmul.f32 %v1466_v3, %v1466_v3 }
 0x1f8   : > { %v1487_v49 = vadd.f32 %v1486_v46, %v1472_v44  ;;  %v1483_v6 = vmul.f32 %v1467_v5, %v1467_v5 }
 0x1f9   : > { %v1484_v10 = vmul.f32 %v1468_v4, %v1468_v4 }
 0x1fa   : > { %v1488_v51 = vadd.f32 %v1487_v49, %v1473_v43 }
 0x1fc   : > { %v1489_v52 = vadd.f32 %v1488_v51, %v1474_v37 }
 0x1fe   : > { %v1490_v57 = vadd.f32 %v1489_v52, %v1475_v53 }
 0x200   : > { %v1491_v50 = vadd.f32 %v1490_v57, %v1476_v23 }
 0x202   : > { %v1492_v54 = vadd.f32 %v1491_v50, %v1477_v55 }
 0x204   : > { %v1493_v60 = vadd.f32 %v1492_v54, %v1478_v62 }
 0x206   : > { %v1494_v48 = vadd.f32 %v1493_v60, %v1479_v2 }
 0x208   : > { %v1495_v29 = vadd.f32 %v1494_v48, %v1480_v0 }
 0x20a   : > { %v1496_v63 = vadd.f32 %v1495_v29, %v1481_v59 }
 0x20c   : > { %v1497_v7 = vadd.f32 %v1496_v63, %v1482_v1 }
 0x20e   : > { %v1498_v9 = vadd.f32 %v1497_v7, %v1483_v6 }
 0x210   : > { %v1499_v12 = vadd.f32 %v1498_v9, %v1484_v10 }
 0x212   : > { %v1500_v13 = vrot.slane %v1499_v12, 4 }
 0x214   : > { %v1501_v15 = vadd.f32 %v1500_v13, %v1499_v12 }
 0x216   : > { %v1502_v19 = vrot.slane %v1501_v15, 2 }
 0x218   : > { %v1503_v17 = vadd.f32 %v1502_v19, %v1501_v15 }
 0x21a   : > { %v1504_v8 = vrot.slane %v1503_v17, 1 }
 0x21c   : > { %v1505_v14 = vadd.f32 %v1504_v8, %v1503_v17 }
 0x21e   : > { %v1507_v21 = vsel %vm1506_vm13, %v2762_v16, %v1505_v14 }
 0x21f   : > { %1508 = vst [vmem:[%s194_s6] sm:$0x3] %v1507_v21 }
 0x220   : > { %2066 = shalt.err (!%p2063_p8)
}
 0x221   : > { %s2067_s28 = scalar_lea.hbm %s2793_s11, 32  ;;  %s2071_s15 = scalar_lea.hbm %s2843_s3, 128 }
 0x222   : > { %p2068_p9 = scmp.ne.s32.totalorder %s2793_s11, %s2067_s28  ;;  %p2072_p12 = scmp.lt.s32.totalorder %s2793_s11, %s2843_s3 }
 0x223   : > { %p2073_p13 = scmp.lt.s32.totalorder %s2071_s15, %s2067_s28 }
 0x224   : > { %p2069_p10 = pnand %p2068_p9, %p2229_p5 }
 0x225   : > { %p2074_p0 = por %p2073_p13, %p2072_p12 }
 0x226   : > { %p2070_p11 = pneg %p2069_p10 }
 0x228   : > { %p2075_p1 = pnand %p2074_p0, %p2070_p11 }
 0x22a   : > { %2078 = shalt.err (!%p2075_p1)
}
 0x22b   : > { %1899 = dma.vmem_to_hbm [thread:$0]  (%p2229_p5), %s1540_s8, 32, %s2793_s11, %s1518_s7  }
 0x22c PF: > { %p1905_p2 = scmp.ge.s32.totalorder %s2145_s19, 2  ;;  %s1562_s6 = sand.u32 1, %s2117_s12  }
 0x22d   : > { %s1563_s9 = scalar_lea.sflag [#allocation3], %s1562_s6 }
 0x22e   : > { %p1902_p3 = pnand %p1905_p2, %p2235_p7 }
 0x230   : > { %p1903_p4 = pneg %p1902_p3 }
 0x232   : > { %2112 = dma.done.wait (%p1903_p4), %s1563_s9, 32  }
 0x233   : > { %2114 = vsyncadd (%p1903_p4), %s1563_s9, 4294967264  ;;  %s17_s19 = sadd.s32 1, %s2145_s19   ;;  %s2846_s12 = smov %s2121_s13 }
 0x234   : > { %p14_p6 = scmp.ge.s32.totalorder %s17_s19, 6   ;;  %s2847_s13 = smov %s2125_s14 }
 0x235   : > { %s2848_s14 = smov %s2245_s5  ;;  %s2849_s15 = smov %s2137_s17 }
 0x236   : > { %s2850_s16 = smov %s2141_s18  ;;  %s2851_s17 = smov %s2854_s21 }
 0x237   : > { %s2852_s18 = smov %s2858_s22  ;;  %16 = sbr.rel (!%p14_p6) target bundleno = 5 (0x5), region = 78 }
 0x23c   :  { %1568 = vsyncpa [#allocation3], 1 }
 0x23d   :  { %1570 = vsyncpa [#allocation3 + $0x1], 1 }

</bundles_post_ra>
